<compile_context>
chip_gen: v7x
topology: tpu7x:2x2x1
jax: 0.10.0
libtpu: 0.0.40
codegen_flags: <defaults>
</compile_context>

<pallas_src>
import functools

import jax
import jax.numpy as jnp
from jax.experimental import pallas as pl
from jax.experimental.pallas import tpu as pltpu


def _lstm_cls_kernel(x2d_ref, wih_ref, b_ref, whh_ref,
                     w1_ref, b1_ref, w2_ref, b2_ref,
                     out_ref, gx_ref, *, seq_len, batch_pad, hidden_size):
    T, Bp, H = seq_len, batch_pad, hidden_size

    # Hoisted input projection for ALL timesteps: one (T*Bp, I) @ (I, 4H)
    # matmul + fused bias, written straight to VMEM scratch so vreg pressure
    # stays flat across the unrolled recurrence.
    gx_ref[...] = (jnp.dot(x2d_ref[...], wih_ref[...],
                           preferred_element_type=jnp.float32)
                   + b_ref[...])                                   # (T*Bp, 4H)

    # Stage the recurrent weight once, off the per-step critical path.
    whh = whh_ref[...]                                             # (H, 4H)

    h = jnp.zeros((Bp, H), jnp.float32)
    c = jnp.zeros((Bp, H), jnp.float32)

    # T is small and static: fully unrolled recurrence; h/c live in vregs.
    for t in range(T):
        # Clean 8-sublane-aligned tile load of this step's input gates.
        g = gx_ref[t * Bp:(t + 1) * Bp, :] + jnp.dot(
            h.astype(whh.dtype), whh, preferred_element_type=jnp.float32)

        # Gate columns are pre-permuted to (i, f, o, g): one tanh-based
        # sigmoid over the contiguous (Bp, 3H) slab, one tanh over (Bp, H).
        sig = 0.5 * (jnp.tanh(0.5 * g[:, 0:3 * H]) + 1.0)
        i_g = sig[:, 0 * H:1 * H]
        f_g = sig[:, 1 * H:2 * H]
        o_g = sig[:, 2 * H:3 * H]
        g_g = jnp.tanh(g[:, 3 * H:4 * H])

        c = f_g * c + i_g * g_g
        h = o_g * jnp.tanh(c)

    # Fused classifier head on the final hidden state.
    z1 = (jnp.dot(jnp.maximum(h, 0.0), w1_ref[...],
                  preferred_element_type=jnp.float32) + b1_ref[...])
    z2 = (jnp.dot(jnp.maximum(z1, 0.0), w2_ref[...],
                  preferred_element_type=jnp.float32) + b2_ref[...])
    out_ref[...] = z2.astype(out_ref.dtype)


def lstm_classifier_forward(x, params, *, hidden_size=128,
                            matmul_dtype=jnp.float32):
    """x: (B, T, I) batch-first, like nn.LSTM(batch_first=True).

    matmul_dtype=jnp.bfloat16 halves MXU passes / weight traffic (best win on
    v5e); default f32 keeps bit-tight numerics vs. the f32 reference.
    """
    B, T, I = x.shape
    H = hidden_size
    C = params["w2"].shape[0]                     # num_classes
    Bp = ((B + 7) // 8) * 8                       # pad batch to sublane (8)

    # Permute gate blocks from PyTorch order (i, f, g, o) -> (i, f, o, g) so
    # the kernel can activate sigmoid-gates as one contiguous slab.
    def permute_gates(w):
        i, f, g, o = jnp.split(w, 4, axis=0)
        return jnp.concatenate([i, f, o, g], axis=0)

    # Pre-transpose weights so every in-kernel matmul is plain (rows,K)@(K,N).
    wih_t = permute_gates(params["w_ih"]).T.astype(matmul_dtype)   # (I, 4H)
    whh_t = permute_gates(params["w_hh"]).T.astype(matmul_dtype)   # (H, 4H)
    b = permute_gates(params["b_ih"] + params["b_hh"]).reshape(1, 4 * H)
    w1_t = params["w1"].T                                          # (H, 64)
    b1 = params["b1"].reshape(1, -1)
    w2_t = params["w2"].T                                          # (64, C)
    b2 = params["b2"].reshape(1, -1)

    # Time-major flatten with batch padded to Bp: row t*Bp + n holds x[n, t, :]
    # (zeros for the padded rows), so the per-step slice gx[t*Bp:(t+1)*Bp] is
    # exactly the (padded) batch at time t, on an 8-sublane tile boundary.
    x_tm = jnp.transpose(x, (1, 0, 2))                             # (T, B, I)
    x_tm = jnp.pad(x_tm, ((0, 0), (0, Bp - B), (0, 0)))
    x2d = x_tm.reshape(T * Bp, I).astype(matmul_dtype)

    kernel = functools.partial(_lstm_cls_kernel,
                               seq_len=T, batch_pad=Bp, hidden_size=H)

    vmem = pl.BlockSpec(memory_space=pltpu.MemorySpace.VMEM)

    # Single invocation (no grid): all operands fit comfortably in VMEM, so
    # the whole recurrence runs in one kernel with no per-timestep pipeline
    # setup/teardown cost.
    out = pl.pallas_call(
        kernel,
        out_shape=jax.ShapeDtypeStruct((Bp, C), jnp.float32),
        in_specs=[vmem] * 8,
        out_specs=vmem,
        scratch_shapes=[pltpu.VMEM((T * Bp, 4 * H), jnp.float32)],
    )(x2d, wih_t, b, whh_t, w1_t, b1, w2_t, b2)
    return out[:B]


def init_params(key, input_size=28, hidden_size=128, num_classes=10):
    """Deterministic init mimicking PyTorch's U(-1/sqrt(H), 1/sqrt(H))."""
    H = hidden_size
    ks = jax.random.split(key, 8)
    s_lstm = 1.0 / jnp.sqrt(H)
    s_fc1 = 1.0 / jnp.sqrt(H)
    s_fc2 = 1.0 / jnp.sqrt(64)
    u = lambda k, shape, s: jax.random.uniform(k, shape, jnp.float32, -s, s)
    return {
        "w_ih": u(ks[0], (4 * H, input_size), s_lstm),
        "w_hh": u(ks[1], (4 * H, H), s_lstm),
        "b_ih": u(ks[2], (4 * H,), s_lstm),
        "b_hh": u(ks[3], (4 * H,), s_lstm),
        "w1":   u(ks[4], (64, H), s_fc1),
        "b1":   u(ks[5], (64,), s_fc1),
        "w2":   u(ks[6], (num_classes, 64), s_fc2),
        "b2":   u(ks[7], (64,) if False else (num_classes,), s_fc2),
    }


def reference_forward(x, p):
    """Pure-JAX reference (matches PyTorch LSTM semantics) for validation."""
    B, T, I = x.shape
    H = p["w_hh"].shape[1]
    h = jnp.zeros((B, H), jnp.float32)
    c = jnp.zeros((B, H), jnp.float32)
    for t in range(T):
        g = x[:, t] @ p["w_ih"].T + h @ p["w_hh"].T + p["b_ih"] + p["b_hh"]
        i_g = jax.nn.sigmoid(g[:, 0 * H:1 * H])
        f_g = jax.nn.sigmoid(g[:, 1 * H:2 * H])
        g_g = jnp.tanh(g[:, 2 * H:3 * H])
        o_g = jax.nn.sigmoid(g[:, 3 * H:4 * H])
        c = f_g * c + i_g * g_g
        h = o_g * jnp.tanh(c)
    z1 = jnp.maximum(h, 0.0) @ p["w1"].T + p["b1"]
    z2 = jnp.maximum(z1, 0.0) @ p["w2"].T + p["b2"]
    return z2


if __name__ == "__main__":
    key = jax.random.PRNGKey(0)
    k_p, k_x = jax.random.split(key)

    B, T, I, H, C = 2, 8, 28, 128, 10
    params = init_params(k_p, input_size=I, hidden_size=H, num_classes=C)
    x = jax.random.normal(k_x, (B, T, I), jnp.float32)

    fwd = jax.jit(functools.partial(lstm_classifier_forward, hidden_size=H))
    out = jax.block_until_ready(fwd(x, params))

    ref = reference_forward(x, params)
    assert out.shape == (B, C)
    assert jnp.allclose(out, ref, atol=2e-4, rtol=2e-4), "mismatch vs reference"

    print("KERNEL_OK")
</pallas_src>

<mosaic_0001>
module attributes {stable_mosaic.version = 11 : i64} {
  func.func @_lstm_cls_kernel(%arg0: memref<64x28xf32, #tpu.memory_space<vmem>>, %arg1: memref<28x512xf32, #tpu.memory_space<vmem>>, %arg2: memref<1x512xf32, #tpu.memory_space<vmem>>, %arg3: memref<128x512xf32, #tpu.memory_space<vmem>>, %arg4: memref<128x64xf32, #tpu.memory_space<vmem>>, %arg5: memref<1x64xf32, #tpu.memory_space<vmem>>, %arg6: memref<64x10xf32, #tpu.memory_space<vmem>>, %arg7: memref<1x10xf32, #tpu.memory_space<vmem>>, %arg8: memref<8x10xf32, #tpu.memory_space<vmem>>, %arg9: memref<64x512xf32, #tpu.memory_space<vmem>>) attributes {dimension_semantics = [], scalar_prefetch = 0 : i64, scratch_operands = 1 : i64, tpu.core_type = #tpu.core_type<tc>} {
    %c0 = arith.constant 0 : index
    %c0_0 = arith.constant 0 : index
    %0 = vector.load %arg0[%c0, %c0_0] : memref<64x28xf32, #tpu.memory_space<vmem>>, vector<64x28xf32>
    %c0_1 = arith.constant 0 : index
    %c0_2 = arith.constant 0 : index
    %1 = vector.load %arg1[%c0_1, %c0_2] : memref<28x512xf32, #tpu.memory_space<vmem>>, vector<28x512xf32>
    %cst = arith.constant dense<0.000000e+00> : vector<64x512xf32>
    %2 = tpu.matmul %0, %1, %cst {dimension_numbers = #tpu.dot_dimension_numbers<[1], [0], [0], [1], [0, 0, 1, 1], [], []>} : vector<64x28xf32>, vector<28x512xf32>, vector<64x512xf32> -> vector<64x512xf32>
    %c0_3 = arith.constant 0 : index
    %c0_4 = arith.constant 0 : index
    %3 = vector.load %arg2[%c0_3, %c0_4] : memref<1x512xf32, #tpu.memory_space<vmem>>, vector<1x512xf32>
    %4 = vector.broadcast %3 : vector<1x512xf32> to vector<64x512xf32>
    %5 = arith.addf %2, %4 : vector<64x512xf32>
    %c0_5 = arith.constant 0 : index
    %c0_6 = arith.constant 0 : index
    %6 = vector.load %arg9[%c0_5, %c0_6] : memref<64x512xf32, #tpu.memory_space<vmem>>, vector<64x512xf32>
    tpu.vector_store %arg9[%c0_5, %c0_6], %5 {strides = array<i32>} : memref<64x512xf32, #tpu.memory_space<vmem>>, vector<64x512xf32>,
    %c0_7 = arith.constant 0 : index
    %c0_8 = arith.constant 0 : index
    %7 = vector.load %arg3[%c0_7, %c0_8] : memref<128x512xf32, #tpu.memory_space<vmem>>, vector<128x512xf32>
    %cst_9 = arith.constant 0.000000e+00 : f32
    %8 = vector.broadcast %cst_9 : f32 to vector<8x128xf32>
    %cst_10 = arith.constant 0.000000e+00 : f32
    %9 = vector.broadcast %cst_10 : f32 to vector<8x128xf32>
    %c0_11 = arith.constant 0 : index
    %c0_12 = arith.constant 0 : index
    %10 = vector.load %arg9[%c0_11, %c0_12] : memref<64x512xf32, #tpu.memory_space<vmem>>, vector<8x512xf32>
    %cst_13 = arith.constant dense<0.000000e+00> : vector<8x512xf32>
    %11 = tpu.matmul %8, %7, %cst_13 {dimension_numbers = #tpu.dot_dimension_numbers<[1], [0], [0], [1], [0, 0, 1, 1], [], []>} : vector<8x128xf32>, vector<128x512xf32>, vector<8x512xf32> -> vector<8x512xf32>
    %12 = arith.addf %10, %11 : vector<8x512xf32>
    %13 = vector.extract_strided_slice %12 {offsets = [0, 0], sizes = [8, 384], strides = [1, 1]} : vector<8x512xf32> to vector<8x384xf32>
    %cst_14 = arith.constant 5.000000e-01 : f32
    %14 = vector.broadcast %cst_14 : f32 to vector<8x384xf32>
    %15 = arith.mulf %14, %13 : vector<8x384xf32>
    %16 = math.tanh %15 : vector<8x384xf32>
    %cst_15 = arith.constant 1.000000e+00 : f32
    %17 = vector.broadcast %cst_15 : f32 to vector<8x384xf32>
    %18 = arith.addf %16, %17 : vector<8x384xf32>
    %cst_16 = arith.constant 5.000000e-01 : f32
    %19 = vector.broadcast %cst_16 : f32 to vector<8x384xf32>
    %20 = arith.mulf %19, %18 : vector<8x384xf32>
    %21 = vector.extract_strided_slice %20 {offsets = [0, 0], sizes = [8, 128], strides = [1, 1]} : vector<8x384xf32> to vector<8x128xf32>
    %22 = vector.extract_strided_slice %20 {offsets = [0, 128], sizes = [8, 128], strides = [1, 1]} : vector<8x384xf32> to vector<8x128xf32>
    %23 = vector.extract_strided_slice %20 {offsets = [0, 256], sizes = [8, 128], strides = [1, 1]} : vector<8x384xf32> to vector<8x128xf32>
    %24 = vector.extract_strided_slice %12 {offsets = [0, 384], sizes = [8, 128], strides = [1, 1]} : vector<8x512xf32> to vector<8x128xf32>
    %25 = math.tanh %24 : vector<8x128xf32>
    %26 = arith.mulf %22, %9 : vector<8x128xf32>
    %27 = arith.mulf %21, %25 : vector<8x128xf32>
    %28 = arith.addf %26, %27 : vector<8x128xf32>
    %29 = math.tanh %28 : vector<8x128xf32>
    %30 = arith.mulf %23, %29 : vector<8x128xf32>
    %c8 = arith.constant 8 : index
    %c0_17 = arith.constant 0 : index
    %31 = vector.load %arg9[%c8, %c0_17] : memref<64x512xf32, #tpu.memory_space<vmem>>, vector<8x512xf32>
    %cst_18 = arith.constant dense<0.000000e+00> : vector<8x512xf32>
    %32 = tpu.matmul %30, %7, %cst_18 {dimension_numbers = #tpu.dot_dimension_numbers<[1], [0], [0], [1], [0, 0, 1, 1], [], []>} : vector<8x128xf32>, vector<128x512xf32>, vector<8x512xf32> -> vector<8x512xf32>
    %33 = arith.addf %31, %32 : vector<8x512xf32>
    %34 = vector.extract_strided_slice %33 {offsets = [0, 0], sizes = [8, 384], strides = [1, 1]} : vector<8x512xf32> to vector<8x384xf32>
    %cst_19 = arith.constant 5.000000e-01 : f32
    %35 = vector.broadcast %cst_19 : f32 to vector<8x384xf32>
    %36 = arith.mulf %35, %34 : vector<8x384xf32>
    %37 = math.tanh %36 : vector<8x384xf32>
    %cst_20 = arith.constant 1.000000e+00 : f32
    %38 = vector.broadcast %cst_20 : f32 to vector<8x384xf32>
    %39 = arith.addf %37, %38 : vector<8x384xf32>
    %cst_21 = arith.constant 5.000000e-01 : f32
    %40 = vector.broadcast %cst_21 : f32 to vector<8x384xf32>
    %41 = arith.mulf %40, %39 : vector<8x384xf32>
    %42 = vector.extract_strided_slice %41 {offsets = [0, 0], sizes = [8, 128], strides = [1, 1]} : vector<8x384xf32> to vector<8x128xf32>
    %43 = vector.extract_strided_slice %41 {offsets = [0, 128], sizes = [8, 128], strides = [1, 1]} : vector<8x384xf32> to vector<8x128xf32>
    %44 = vector.extract_strided_slice %41 {offsets = [0, 256], sizes = [8, 128], strides = [1, 1]} : vector<8x384xf32> to vector<8x128xf32>
    %45 = vector.extract_strided_slice %33 {offsets = [0, 384], sizes = [8, 128], strides = [1, 1]} : vector<8x512xf32> to vector<8x128xf32>
    %46 = math.tanh %45 : vector<8x128xf32>
    %47 = arith.mulf %43, %28 : vector<8x128xf32>
    %48 = arith.mulf %42, %46 : vector<8x128xf32>
    %49 = arith.addf %47, %48 : vector<8x128xf32>
    %50 = math.tanh %49 : vector<8x128xf32>
    %51 = arith.mulf %44, %50 : vector<8x128xf32>
    %c16 = arith.constant 16 : index
    %c0_22 = arith.constant 0 : index
    %52 = vector.load %arg9[%c16, %c0_22] : memref<64x512xf32, #tpu.memory_space<vmem>>, vector<8x512xf32>
    %cst_23 = arith.constant dense<0.000000e+00> : vector<8x512xf32>
    %53 = tpu.matmul %51, %7, %cst_23 {dimension_numbers = #tpu.dot_dimension_numbers<[1], [0], [0], [1], [0, 0, 1, 1], [], []>} : vector<8x128xf32>, vector<128x512xf32>, vector<8x512xf32> -> vector<8x512xf32>
    %54 = arith.addf %52, %53 : vector<8x512xf32>
    %55 = vector.extract_strided_slice %54 {offsets = [0, 0], sizes = [8, 384], strides = [1, 1]} : vector<8x512xf32> to vector<8x384xf32>
    %cst_24 = arith.constant 5.000000e-01 : f32
    %56 = vector.broadcast %cst_24 : f32 to vector<8x384xf32>
    %57 = arith.mulf %56, %55 : vector<8x384xf32>
    %58 = math.tanh %57 : vector<8x384xf32>
    %cst_25 = arith.constant 1.000000e+00 : f32
    %59 = vector.broadcast %cst_25 : f32 to vector<8x384xf32>
    %60 = arith.addf %58, %59 : vector<8x384xf32>
    %cst_26 = arith.constant 5.000000e-01 : f32
    %61 = vector.broadcast %cst_26 : f32 to vector<8x384xf32>
    %62 = arith.mulf %61, %60 : vector<8x384xf32>
    %63 = vector.extract_strided_slice %62 {offsets = [0, 0], sizes = [8, 128], strides = [1, 1]} : vector<8x384xf32> to vector<8x128xf32>
    %64 = vector.extract_strided_slice %62 {offsets = [0, 128], sizes = [8, 128], strides = [1, 1]} : vector<8x384xf32> to vector<8x128xf32>
    %65 = vector.extract_strided_slice %62 {offsets = [0, 256], sizes = [8, 128], strides = [1, 1]} : vector<8x384xf32> to vector<8x128xf32>
    %66 = vector.extract_strided_slice %54 {offsets = [0, 384], sizes = [8, 128], strides = [1, 1]} : vector<8x512xf32> to vector<8x128xf32>
    %67 = math.tanh %66 : vector<8x128xf32>
    %68 = arith.mulf %64, %49 : vector<8x128xf32>
    %69 = arith.mulf %63, %67 : vector<8x128xf32>
    %70 = arith.addf %68, %69 : vector<8x128xf32>
    %71 = math.tanh %70 : vector<8x128xf32>
    %72 = arith.mulf %65, %71 : vector<8x128xf32>
    %c24 = arith.constant 24 : index
    %c0_27 = arith.constant 0 : index
    %73 = vector.load %arg9[%c24, %c0_27] : memref<64x512xf32, #tpu.memory_space<vmem>>, vector<8x512xf32>
    %cst_28 = arith.constant dense<0.000000e+00> : vector<8x512xf32>
    %74 = tpu.matmul %72, %7, %cst_28 {dimension_numbers = #tpu.dot_dimension_numbers<[1], [0], [0], [1], [0, 0, 1, 1], [], []>} : vector<8x128xf32>, vector<128x512xf32>, vector<8x512xf32> -> vector<8x512xf32>
    %75 = arith.addf %73, %74 : vector<8x512xf32>
    %76 = vector.extract_strided_slice %75 {offsets = [0, 0], sizes = [8, 384], strides = [1, 1]} : vector<8x512xf32> to vector<8x384xf32>
    %cst_29 = arith.constant 5.000000e-01 : f32
    %77 = vector.broadcast %cst_29 : f32 to vector<8x384xf32>
    %78 = arith.mulf %77, %76 : vector<8x384xf32>
    %79 = math.tanh %78 : vector<8x384xf32>
    %cst_30 = arith.constant 1.000000e+00 : f32
    %80 = vector.broadcast %cst_30 : f32 to vector<8x384xf32>
    %81 = arith.addf %79, %80 : vector<8x384xf32>
    %cst_31 = arith.constant 5.000000e-01 : f32
    %82 = vector.broadcast %cst_31 : f32 to vector<8x384xf32>
    %83 = arith.mulf %82, %81 : vector<8x384xf32>
    %84 = vector.extract_strided_slice %83 {offsets = [0, 0], sizes = [8, 128], strides = [1, 1]} : vector<8x384xf32> to vector<8x128xf32>
    %85 = vector.extract_strided_slice %83 {offsets = [0, 128], sizes = [8, 128], strides = [1, 1]} : vector<8x384xf32> to vector<8x128xf32>
    %86 = vector.extract_strided_slice %83 {offsets = [0, 256], sizes = [8, 128], strides = [1, 1]} : vector<8x384xf32> to vector<8x128xf32>
    %87 = vector.extract_strided_slice %75 {offsets = [0, 384], sizes = [8, 128], strides = [1, 1]} : vector<8x512xf32> to vector<8x128xf32>
    %88 = math.tanh %87 : vector<8x128xf32>
    %89 = arith.mulf %85, %70 : vector<8x128xf32>
    %90 = arith.mulf %84, %88 : vector<8x128xf32>
    %91 = arith.addf %89, %90 : vector<8x128xf32>
    %92 = math.tanh %91 : vector<8x128xf32>
    %93 = arith.mulf %86, %92 : vector<8x128xf32>
    %c32 = arith.constant 32 : index
    %c0_32 = arith.constant 0 : index
    %94 = vector.load %arg9[%c32, %c0_32] : memref<64x512xf32, #tpu.memory_space<vmem>>, vector<8x512xf32>
    %cst_33 = arith.constant dense<0.000000e+00> : vector<8x512xf32>
    %95 = tpu.matmul %93, %7, %cst_33 {dimension_numbers = #tpu.dot_dimension_numbers<[1], [0], [0], [1], [0, 0, 1, 1], [], []>} : vector<8x128xf32>, vector<128x512xf32>, vector<8x512xf32> -> vector<8x512xf32>
    %96 = arith.addf %94, %95 : vector<8x512xf32>
    %97 = vector.extract_strided_slice %96 {offsets = [0, 0], sizes = [8, 384], strides = [1, 1]} : vector<8x512xf32> to vector<8x384xf32>
    %cst_34 = arith.constant 5.000000e-01 : f32
    %98 = vector.broadcast %cst_34 : f32 to vector<8x384xf32>
    %99 = arith.mulf %98, %97 : vector<8x384xf32>
    %100 = math.tanh %99 : vector<8x384xf32>
    %cst_35 = arith.constant 1.000000e+00 : f32
    %101 = vector.broadcast %cst_35 : f32 to vector<8x384xf32>
    %102 = arith.addf %100, %101 : vector<8x384xf32>
    %cst_36 = arith.constant 5.000000e-01 : f32
    %103 = vector.broadcast %cst_36 : f32 to vector<8x384xf32>
    %104 = arith.mulf %103, %102 : vector<8x384xf32>
    %105 = vector.extract_strided_slice %104 {offsets = [0, 0], sizes = [8, 128], strides = [1, 1]} : vector<8x384xf32> to vector<8x128xf32>
    %106 = vector.extract_strided_slice %104 {offsets = [0, 128], sizes = [8, 128], strides = [1, 1]} : vector<8x384xf32> to vector<8x128xf32>
    %107 = vector.extract_strided_slice %104 {offsets = [0, 256], sizes = [8, 128], strides = [1, 1]} : vector<8x384xf32> to vector<8x128xf32>
    %108 = vector.extract_strided_slice %96 {offsets = [0, 384], sizes = [8, 128], strides = [1, 1]} : vector<8x512xf32> to vector<8x128xf32>
    %109 = math.tanh %108 : vector<8x128xf32>
    %110 = arith.mulf %106, %91 : vector<8x128xf32>
    %111 = arith.mulf %105, %109 : vector<8x128xf32>
    %112 = arith.addf %110, %111 : vector<8x128xf32>
    %113 = math.tanh %112 : vector<8x128xf32>
    %114 = arith.mulf %107, %113 : vector<8x128xf32>
    %c40 = arith.constant 40 : index
    %c0_37 = arith.constant 0 : index
    %115 = vector.load %arg9[%c40, %c0_37] : memref<64x512xf32, #tpu.memory_space<vmem>>, vector<8x512xf32>
    %cst_38 = arith.constant dense<0.000000e+00> : vector<8x512xf32>
    %116 = tpu.matmul %114, %7, %cst_38 {dimension_numbers = #tpu.dot_dimension_numbers<[1], [0], [0], [1], [0, 0, 1, 1], [], []>} : vector<8x128xf32>, vector<128x512xf32>, vector<8x512xf32> -> vector<8x512xf32>
    %117 = arith.addf %115, %116 : vector<8x512xf32>
    %118 = vector.extract_strided_slice %117 {offsets = [0, 0], sizes = [8, 384], strides = [1, 1]} : vector<8x512xf32> to vector<8x384xf32>
    %cst_39 = arith.constant 5.000000e-01 : f32
    %119 = vector.broadcast %cst_39 : f32 to vector<8x384xf32>
    %120 = arith.mulf %119, %118 : vector<8x384xf32>
    %121 = math.tanh %120 : vector<8x384xf32>
    %cst_40 = arith.constant 1.000000e+00 : f32
    %122 = vector.broadcast %cst_40 : f32 to vector<8x384xf32>
    %123 = arith.addf %121, %122 : vector<8x384xf32>
    %cst_41 = arith.constant 5.000000e-01 : f32
    %124 = vector.broadcast %cst_41 : f32 to vector<8x384xf32>
    %125 = arith.mulf %124, %123 : vector<8x384xf32>
    %126 = vector.extract_strided_slice %125 {offsets = [0, 0], sizes = [8, 128], strides = [1, 1]} : vector<8x384xf32> to vector<8x128xf32>
    %127 = vector.extract_strided_slice %125 {offsets = [0, 128], sizes = [8, 128], strides = [1, 1]} : vector<8x384xf32> to vector<8x128xf32>
    %128 = vector.extract_strided_slice %125 {offsets = [0, 256], sizes = [8, 128], strides = [1, 1]} : vector<8x384xf32> to vector<8x128xf32>
    %129 = vector.extract_strided_slice %117 {offsets = [0, 384], sizes = [8, 128], strides = [1, 1]} : vector<8x512xf32> to vector<8x128xf32>
    %130 = math.tanh %129 : vector<8x128xf32>
    %131 = arith.mulf %127, %112 : vector<8x128xf32>
    %132 = arith.mulf %126, %130 : vector<8x128xf32>
    %133 = arith.addf %131, %132 : vector<8x128xf32>
    %134 = math.tanh %133 : vector<8x128xf32>
    %135 = arith.mulf %128, %134 : vector<8x128xf32>
    %c48 = arith.constant 48 : index
    %c0_42 = arith.constant 0 : index
    %136 = vector.load %arg9[%c48, %c0_42] : memref<64x512xf32, #tpu.memory_space<vmem>>, vector<8x512xf32>
    %cst_43 = arith.constant dense<0.000000e+00> : vector<8x512xf32>
    %137 = tpu.matmul %135, %7, %cst_43 {dimension_numbers = #tpu.dot_dimension_numbers<[1], [0], [0], [1], [0, 0, 1, 1], [], []>} : vector<8x128xf32>, vector<128x512xf32>, vector<8x512xf32> -> vector<8x512xf32>
    %138 = arith.addf %136, %137 : vector<8x512xf32>
    %139 = vector.extract_strided_slice %138 {offsets = [0, 0], sizes = [8, 384], strides = [1, 1]} : vector<8x512xf32> to vector<8x384xf32>
    %cst_44 = arith.constant 5.000000e-01 : f32
    %140 = vector.broadcast %cst_44 : f32 to vector<8x384xf32>
    %141 = arith.mulf %140, %139 : vector<8x384xf32>
    %142 = math.tanh %141 : vector<8x384xf32>
    %cst_45 = arith.constant 1.000000e+00 : f32
    %143 = vector.broadcast %cst_45 : f32 to vector<8x384xf32>
    %144 = arith.addf %142, %143 : vector<8x384xf32>
    %cst_46 = arith.constant 5.000000e-01 : f32
    %145 = vector.broadcast %cst_46 : f32 to vector<8x384xf32>
    %146 = arith.mulf %145, %144 : vector<8x384xf32>
    %147 = vector.extract_strided_slice %146 {offsets = [0, 0], sizes = [8, 128], strides = [1, 1]} : vector<8x384xf32> to vector<8x128xf32>
    %148 = vector.extract_strided_slice %146 {offsets = [0, 128], sizes = [8, 128], strides = [1, 1]} : vector<8x384xf32> to vector<8x128xf32>
    %149 = vector.extract_strided_slice %146 {offsets = [0, 256], sizes = [8, 128], strides = [1, 1]} : vector<8x384xf32> to vector<8x128xf32>
    %150 = vector.extract_strided_slice %138 {offsets = [0, 384], sizes = [8, 128], strides = [1, 1]} : vector<8x512xf32> to vector<8x128xf32>
    %151 = math.tanh %150 : vector<8x128xf32>
    %152 = arith.mulf %148, %133 : vector<8x128xf32>
    %153 = arith.mulf %147, %151 : vector<8x128xf32>
    %154 = arith.addf %152, %153 : vector<8x128xf32>
    %155 = math.tanh %154 : vector<8x128xf32>
    %156 = arith.mulf %149, %155 : vector<8x128xf32>
    %c56 = arith.constant 56 : index
    %c0_47 = arith.constant 0 : index
    %157 = vector.load %arg9[%c56, %c0_47] : memref<64x512xf32, #tpu.memory_space<vmem>>, vector<8x512xf32>
    %cst_48 = arith.constant dense<0.000000e+00> : vector<8x512xf32>
    %158 = tpu.matmul %156, %7, %cst_48 {dimension_numbers = #tpu.dot_dimension_numbers<[1], [0], [0], [1], [0, 0, 1, 1], [], []>} : vector<8x128xf32>, vector<128x512xf32>, vector<8x512xf32> -> vector<8x512xf32>
    %159 = arith.addf %157, %158 : vector<8x512xf32>
    %160 = vector.extract_strided_slice %159 {offsets = [0, 0], sizes = [8, 384], strides = [1, 1]} : vector<8x512xf32> to vector<8x384xf32>
    %cst_49 = arith.constant 5.000000e-01 : f32
    %161 = vector.broadcast %cst_49 : f32 to vector<8x384xf32>
    %162 = arith.mulf %161, %160 : vector<8x384xf32>
    %163 = math.tanh %162 : vector<8x384xf32>
    %cst_50 = arith.constant 1.000000e+00 : f32
    %164 = vector.broadcast %cst_50 : f32 to vector<8x384xf32>
    %165 = arith.addf %163, %164 : vector<8x384xf32>
    %cst_51 = arith.constant 5.000000e-01 : f32
    %166 = vector.broadcast %cst_51 : f32 to vector<8x384xf32>
    %167 = arith.mulf %166, %165 : vector<8x384xf32>
    %168 = vector.extract_strided_slice %167 {offsets = [0, 0], sizes = [8, 128], strides = [1, 1]} : vector<8x384xf32> to vector<8x128xf32>
    %169 = vector.extract_strided_slice %167 {offsets = [0, 128], sizes = [8, 128], strides = [1, 1]} : vector<8x384xf32> to vector<8x128xf32>
    %170 = vector.extract_strided_slice %167 {offsets = [0, 256], sizes = [8, 128], strides = [1, 1]} : vector<8x384xf32> to vector<8x128xf32>
    %171 = vector.extract_strided_slice %159 {offsets = [0, 384], sizes = [8, 128], strides = [1, 1]} : vector<8x512xf32> to vector<8x128xf32>
    %172 = math.tanh %171 : vector<8x128xf32>
    %173 = arith.mulf %169, %154 : vector<8x128xf32>
    %174 = arith.mulf %168, %172 : vector<8x128xf32>
    %175 = arith.addf %173, %174 : vector<8x128xf32>
    %176 = math.tanh %175 : vector<8x128xf32>
    %177 = arith.mulf %170, %176 : vector<8x128xf32>
    %cst_52 = arith.constant 0.000000e+00 : f32
    %178 = vector.broadcast %cst_52 : f32 to vector<8x128xf32>
    %179 = arith.maximumf %177, %178 : vector<8x128xf32>
    %c0_53 = arith.constant 0 : index
    %c0_54 = arith.constant 0 : index
    %180 = vector.load %arg4[%c0_53, %c0_54] : memref<128x64xf32, #tpu.memory_space<vmem>>, vector<128x64xf32>
    %cst_55 = arith.constant dense<0.000000e+00> : vector<8x64xf32>
    %181 = tpu.matmul %179, %180, %cst_55 {dimension_numbers = #tpu.dot_dimension_numbers<[1], [0], [0], [1], [0, 0, 1, 1], [], []>} : vector<8x128xf32>, vector<128x64xf32>, vector<8x64xf32> -> vector<8x64xf32>
    %c0_56 = arith.constant 0 : index
    %c0_57 = arith.constant 0 : index
    %182 = vector.load %arg5[%c0_56, %c0_57] : memref<1x64xf32, #tpu.memory_space<vmem>>, vector<1x64xf32>
    %183 = vector.broadcast %182 : vector<1x64xf32> to vector<8x64xf32>
    %184 = arith.addf %181, %183 : vector<8x64xf32>
    %cst_58 = arith.constant 0.000000e+00 : f32
    %185 = vector.broadcast %cst_58 : f32 to vector<8x64xf32>
    %186 = arith.maximumf %184, %185 : vector<8x64xf32>
    %c0_59 = arith.constant 0 : index
    %c0_60 = arith.constant 0 : index
    %187 = vector.load %arg6[%c0_59, %c0_60] : memref<64x10xf32, #tpu.memory_space<vmem>>, vector<64x10xf32>
    %cst_61 = arith.constant dense<0.000000e+00> : vector<8x10xf32>
    %188 = tpu.matmul %186, %187, %cst_61 {dimension_numbers = #tpu.dot_dimension_numbers<[1], [0], [0], [1], [0, 0, 1, 1], [], []>} : vector<8x64xf32>, vector<64x10xf32>, vector<8x10xf32> -> vector<8x10xf32>
    %c0_62 = arith.constant 0 : index
    %c0_63 = arith.constant 0 : index
    %189 = vector.load %arg7[%c0_62, %c0_63] : memref<1x10xf32, #tpu.memory_space<vmem>>, vector<1x10xf32>
    %190 = vector.broadcast %189 : vector<1x10xf32> to vector<8x10xf32>
    %191 = arith.addf %188, %190 : vector<8x10xf32>
    %c0_64 = arith.constant 0 : index
    %c0_65 = arith.constant 0 : index
    %192 = vector.load %arg8[%c0_64, %c0_65] : memref<8x10xf32, #tpu.memory_space<vmem>>, vector<8x10xf32>
    tpu.vector_store %arg8[%c0_64, %c0_65], %191 {strides = array<i32>} : memref<8x10xf32, #tpu.memory_space<vmem>>, vector<8x10xf32>,
    return
  }
}

</mosaic_0001>

<bundles_post_ra>
// kernel: lstm_classifier_forward.1
= control target key start
LH: loop header
LB: loop body
LE: loop exit
PB: predicated region body
PF: predicated region fallthrough
CT: control target
= control target key end

     0   :  { %vm100_vm0 = vcmask 1043456   ;;  %v2788_v3 = vmov 0.0   ;;  %vm2789_vm1 = vmmov 1   ;;  %vm75_vm3 = vcmask 228352   ;;  %s3638_s1 = inlined_call_operand.vmem [shape: f32[28,512], index: 1, kind: input, shape index: {}]   ;;  %s3639_s3 = inlined_call_operand.vmem [shape: f32[128,512], index: 3, kind: input, shape index: {}]   ;;  %s3640_s0 = inlined_call_operand.vmem [shape: f32[64,28], index: 0, kind: input, shape index: {}]   ;;  %s3641_s2 = inlined_call_operand.vmem [shape: f32[1,512], index: 2, kind: input, shape index: {}]   ;;  %s3642_s4 = inlined_call_operand.vmem [shape: f32[128,64], index: 4, kind: input, shape index: {}]   ;;  %s3643_s6 = inlined_call_operand.vmem [shape: f32[64,10], index: 6, kind: input, shape index: {}]   ;;  %s3644_s5 = inlined_call_operand.vmem [shape: f32[1,64], index: 5, kind: input, shape index: {}]   ;;  %s3645_s7 = inlined_call_operand.vmem [shape: f32[1,10], index: 7, kind: input, shape index: {}]   ;;  %s3646_s8 = inlined_call_operand.vmem [shape: f32[8,10], index: 8, kind: output, shape index: {}]  }
   0x1   :  { %v38_v0 = vld [vmem:[%s3638_s1 + $0x8] sm:$0xff]  ;;  %v40_v2 = vld [vmem:[%s3638_s1 + $0x18] sm:$0xff]  ;;  %177 = vmatprep.mubr.f32.mxu0 %v2788_v3  ;;  %290 = vmatprep.mubr.f32.mxu1 %v2788_v3  ;;  %v37_v6 = vld [vmem:[%s3638_s1] sm:$0xff]  ;;  %vm2791_vm4 = vmmov 0   ;;  %vm1889_vm5 = vcmask 523264   ;;  %vm1963_vm6 = vcmask 80896  }
   0x2   :  { %v42_v1 = vld [vmem:[%s3638_s1 + $0x28] sm:$0xff]  ;;  %v44_v5 = vld [vmem:[%s3638_s1 + $0x38] sm:$0xff]  ;;  %v41_v7 = vld [vmem:[%s3638_s1 + $0x20] sm:$0xff] }
   0x3   :  { %v2072_v4 = vpack.c.bf16 %v42_v1, %v38_v0  ;;  %v2082_v8 = vpack.c.bf16 %v44_v5, %v40_v2  ;;  %v2074_v9 = vpack.c.bf16 %v41_v7, %v37_v6  ;;  %v39_v10 = vld [vmem:[%s3638_s1 + $0x10] sm:$0xff]  ;;  %v46_v12 = vld [vmem:[%s3638_s1 + $0x48] sm:$0xff]  ;;  %vm2870_vm2 = vmpackc.low %vm100_vm0, %vm2789_vm1 }
   0x4   :  { %v43_v11 = vld [vmem:[%s3638_s1 + $0x30] sm:$0xff]  ;;  %v50_v14 = vld [vmem:[%s3638_s1 + $0x68] sm:$0xf]  ;;  %v48_v16 = vld [vmem:[%s3638_s1 + $0x58] sm:$0xff] }
   0x5   :  { %2073 = vmatprep.subr.bf16.mxu0 %v2072_v4  ;;  %v2084_v13 = vpack.c.bf16 %v43_v11, %v39_v10  ;;  %2083 = vmatprep.subr.bf16.mxu1 %v2082_v8  ;;  %v2076_v17 = vpack.c.bf16 %v50_v14, %v46_v12  ;;  %v52_v18 = vld [vmem:[%s3638_s1 + $0x78] sm:$0xf]  ;;  %v45_v19 = vld [vmem:[%s3638_s1 + $0x40] sm:$0xff]  ;;  %v47_v23 = vld [vmem:[%s3638_s1 + $0x50] sm:$0xff] }
   0x6   :  { %2075 = vmatpush1.bf16.msra.mxu0 %v2074_v9  ;;  %v49_v20 = vld [vmem:[%s3638_s1 + $0x60] sm:$0xf]  ;;  %v2086_v21 = vpack.c.bf16 %v52_v18, %v48_v16  ;;  %v51_v24 = vld [vmem:[%s3638_s1 + $0x70] sm:$0xf]  ;;  %v372_v26 = vld [vmem:[%s3639_s3 + $0x8] sm:$0xff] }
   0x7   :  { %2085 = vmatpush1.bf16.msra.mxu1 %v2084_v13  ;;  %v2079_v22 = vpack.c.bf16 %v49_v20, %v45_v19  ;;  %2078 = vmatprep.subr.msk.bf16.mxu0 %vm2870_vm2, %v2076_v17  ;;  %v2089_v25 = vpack.c.bf16 %v51_v24, %v47_v23  ;;  %v376_v27 = vld [vmem:[%s3639_s3 + $0x28] sm:$0xff]  ;;  %v374_v28 = vld [vmem:[%s3639_s3 + $0x18] sm:$0xff]  ;;  %v371_v31 = vld [vmem:[%s3639_s3] sm:$0xff] }
   0x8   :  { %2088 = vmatprep.subr.msk.bf16.mxu1 %vm2870_vm2, %v2086_v21  ;;  %v2905_v29 = vpack.c.bf16 %v376_v27, %v372_v26  ;;  %v378_v30 = vld [vmem:[%s3639_s3 + $0x38] sm:$0xff]  ;;  %v375_v32 = vld [vmem:[%s3639_s3 + $0x20] sm:$0xff]  ;;  %v373_v36 = vld [vmem:[%s3639_s3 + $0x10] sm:$0xff] }
   0x9   :  { %v29_v33 = vld [vmem:[%s3640_s0] sm:$0xff]  ;;  %v2921_v34 = vpack.c.bf16 %v378_v30, %v374_v28  ;;  %v2923_v35 = vpack.c.bf16 %v375_v32, %v371_v31  ;;  %v377_v37 = vld [vmem:[%s3639_s3 + $0x30] sm:$0xff]  ;;  %v380_v39 = vld [vmem:[%s3639_s3 + $0x48] sm:$0xff] }
   0xa   :  { %2081 = vmatpush1.bf16.msk.msra.mxu0 %vm2870_vm2, %v2079_v22  ;;  %v2934_v38 = vpack.c.bf16 %v377_v37, %v373_v36  ;;  %v384_v40 = vld [vmem:[%s3639_s3 + $0x68] sm:$0xff]  ;;  %v382_v41 = vld [vmem:[%s3639_s3 + $0x58] sm:$0xff]  ;;  %v379_v44 = vld [vmem:[%s3639_s3 + $0x40] sm:$0xff] }
   0xb   :  { %2091 = vmatpush1.bf16.msk.msra.mxu1 %vm2870_vm2, %v2089_v25  ;;  %2093 = vmatprep.subr.bf16.mxu0 %v2905_v29  ;;  %v2946_v42 = vpack.c.bf16 %v384_v40, %v380_v39  ;;  %v386_v43 = vld [vmem:[%s3639_s3 + $0x78] sm:$0xff]  ;;  %v383_v45 = vld [vmem:[%s3639_s3 + $0x60] sm:$0xff]  ;;  %v30_v46 = vld [vmem:[%s3640_s0 + $0x8] sm:$0xff] }
   0xc   :  { %2125 = vmatprep.subr.bf16.mxu1 %v2921_v34  ;;  %v2961_v47 = vpack.c.bf16 %v386_v43, %v382_v41  ;;  %v381_v48 = vld [vmem:[%s3639_s3 + $0x50] sm:$0xff]  ;;  %v2971_v50 = vpack.c.bf16 %v383_v45, %v379_v44  ;;  %v388_v51 = vld [vmem:[%s3639_s3 + $0x88] sm:$0xff]  ;;  %v390_v53 = vld [vmem:[%s3639_s3 + $0x98] sm:$0xff] }
   0xd   :  { %1971 = vmatmul.mubr.msk.f32.vlgmr.msra.gmra.mrb[0].mxu0 %vm75_vm3, %v29_v33  ;;  %v385_v49 = vld [vmem:[%s3639_s3 + $0x70] sm:$0xff]  ;;  %v392_v52 = vld [vmem:[%s3639_s3 + $0xa8] sm:$0xff]  ;;  %v394_v55 = vld [vmem:[%s3639_s3 + $0xb8] sm:$0xff] }
   0xe   :  { %1981 = vmatmul.mubr.msk.f32.vlgmr.msra.gmra.mrb[0].mxu1 %vm75_vm3, %v29_v33  ;;  %2095 = vmatpush1.bf16.msra.mxu0 %v2923_v35  ;;  %v2984_v54 = vpack.c.bf16 %v385_v49, %v381_v48  ;;  %v387_v56 = vld [vmem:[%s3639_s3 + $0x80] sm:$0xff]  ;;  %v2997_v58 = vpack.c.bf16 %v392_v52, %v388_v51  ;;  %v389_v59 = vld [vmem:[%s3639_s3 + $0x90] sm:$0xff]  ;;  %v3007_v61 = vpack.c.bf16 %v394_v55, %v390_v53  ;;  %v396_v62 = vld [vmem:[%s3639_s3 + $0xc8] sm:$0xff] }
   0xf   :  { %2127 = vmatpush1.bf16.msra.mxu1 %v2934_v38  ;;  %183 = vmatprep.mubr.f32.mxu0 %v2788_v3  ;;  %v391_v57 = vld [vmem:[%s3639_s3 + $0xa0] sm:$0xff]  ;;  %v393_v60 = vld [vmem:[%s3639_s3 + $0xb0] sm:$0xff]  ;;  %v400_v63 = vld [vmem:[%s3639_s3 + $0xe8] sm:$0xff] }
  0x10   :  { %296 = vmatprep.mubr.f32.mxu1 %v2788_v3  ;;  %2097 = vmatprep.subr.bf16.mxu0 %v2946_v42  ;;  %v31_v0 = vld [vmem:[%s3640_s0 + $0x10] sm:$0xff]  ;;  %v3020_v1 = vpack.c.bf16 %v391_v57, %v387_v56  ;;  %v398_v2 = vld [vmem:[%s3639_s3 + $0xd8] sm:$0xff]  ;;  %v3030_v5 = vpack.c.bf16 %v393_v60, %v389_v59  ;;  %v395_v6 = vld [vmem:[%s3639_s3 + $0xc0] sm:$0xff]  ;;  %v3040_v8 = vpack.c.bf16 %v400_v63, %v396_v62 }
  0x11   :  { %1972 = vmatmul.mubr.msk.f32.gmra.mrb[2].mxu0 %vm75_vm3, %v30_v46  ;;  %2129 = vmatprep.subr.bf16.mxu1 %v2961_v47  ;;  %v402_v4 = vld [vmem:[%s3639_s3 + $0xf8] sm:$0xff]  ;;  %v399_v7 = vld [vmem:[%s3639_s3 + $0xe0] sm:$0xff]  ;;  %v397_v9 = vld [vmem:[%s3639_s3 + $0xd0] sm:$0xff] }
  0x12   :  { %1982 = vmatmul.mubr.msk.f32.gmra.mrb[2].mxu1 %vm75_vm3, %v30_v46  ;;  %2099 = vmatpush1.bf16.msra.mxu0 %v2971_v50  ;;  %v401_v10 = vld [vmem:[%s3639_s3 + $0xf0] sm:$0xff]  ;;  %v3050_v11 = vpack.c.bf16 %v402_v4, %v398_v2  ;;  %v404_v12 = vld [vmem:[%s3639_s3 + $0x108] sm:$0xff]  ;;  %v32_v14 = vld [vmem:[%s3640_s0 + $0x18] sm:$0xff]  ;;  %v3063_v15 = vpack.c.bf16 %v399_v7, %v395_v6 }
  0x13   :  { %2131 = vmatpush1.bf16.msra.mxu1 %v2984_v54  ;;  %189 = vmatprep.mubr.f32.mxu0 %v2788_v3  ;;  %v408_v13 = vld [vmem:[%s3639_s3 + $0x128] sm:$0xff]  ;;  %v406_v16 = vld [vmem:[%s3639_s3 + $0x118] sm:$0xff]  ;;  %v3073_v18 = vpack.c.bf16 %v401_v10, %v397_v9  ;;  %v403_v19 = vld [vmem:[%s3639_s3 + $0x100] sm:$0xff] }
  0x14   :  { %302 = vmatprep.mubr.f32.mxu1 %v2788_v3  ;;  %2101 = vmatprep.subr.bf16.mxu0 %v2997_v58  ;;  %v410_v17 = vld [vmem:[%s3639_s3 + $0x138] sm:$0xff]  ;;  %v407_v20 = vld [vmem:[%s3639_s3 + $0x120] sm:$0xff]  ;;  %v3083_v21 = vpack.c.bf16 %v408_v13, %v404_v12  ;;  %v405_v22 = vld [vmem:[%s3639_s3 + $0x110] sm:$0xff] }
  0x15   :  { %1973 = vmatmul.mubr.msk.f32.gmra.mrb[4].mxu0 %vm75_vm3, %v31_v0  ;;  %2133 = vmatprep.subr.bf16.mxu1 %v3007_v61  ;;  %v409_v23 = vld [vmem:[%s3639_s3 + $0x130] sm:$0xff]  ;;  %v3093_v24 = vpack.c.bf16 %v410_v17, %v406_v16  ;;  %v412_v25 = vld [vmem:[%s3639_s3 + $0x148] sm:$0xff]  ;;  %v33_v27 = vld [vmem:[%s3640_s0 + $0x20] sm:$0xff]  ;;  %v3106_v28 = vpack.c.bf16 %v407_v20, %v403_v19  ;;  %v55_v20 = vlaneseq }
  0x16   :  { %1983 = vmatmul.mubr.msk.f32.gmra.mrb[4].mxu1 %vm75_vm3, %v31_v0  ;;  %2103 = vmatpush1.bf16.msra.mxu0 %v3020_v1  ;;  %v416_v26 = vld [vmem:[%s3639_s3 + $0x168] sm:$0xff]  ;;  %v414_v30 = vld [vmem:[%s3639_s3 + $0x158] sm:$0xff]  ;;  %v3116_v32 = vpack.c.bf16 %v409_v23, %v405_v22  ;;  %v411_v33 = vld [vmem:[%s3639_s3 + $0x140] sm:$0xff] }
  0x17   :  { %2135 = vmatpush1.bf16.msra.mxu1 %v3030_v5  ;;  %195 = vmatprep.mubr.f32.mxu0 %v2788_v3  ;;  %v418_v31 = vld [vmem:[%s3639_s3 + $0x178] sm:$0xff]  ;;  %v415_v36 = vld [vmem:[%s3639_s3 + $0x160] sm:$0xff]  ;;  %v3126_v37 = vpack.c.bf16 %v416_v26, %v412_v25  ;;  %v413_v39 = vld [vmem:[%s3639_s3 + $0x150] sm:$0xff]  ;;  %v56_v22 = vshrl.u32 %v55_v20, 7 }
  0x18   :  { %308 = vmatprep.mubr.f32.mxu1 %v2788_v3  ;;  %2105 = vmatprep.subr.bf16.mxu0 %v3040_v8  ;;  %v417_v40 = vld [vmem:[%s3639_s3 + $0x170] sm:$0xff]  ;;  %v3136_v41 = vpack.c.bf16 %v418_v31, %v414_v30  ;;  %v420_v43 = vld [vmem:[%s3639_s3 + $0x188] sm:$0xff]  ;;  %v3149_v46 = vpack.c.bf16 %v415_v36, %v411_v33  ;;  %v422_v48 = vld [vmem:[%s3639_s3 + $0x198] sm:$0xff] }
  0x19   :  { %1974 = vmatmul.mubr.msk.f32.gmra.mrb[6].mxu0 %vm75_vm3, %v32_v14  ;;  %2137 = vmatprep.subr.bf16.mxu1 %v3050_v11  ;;  %v424_v44 = vld [vmem:[%s3639_s3 + $0x1a8] sm:$0xff]  ;;  %v426_v49 = vld [vmem:[%s3639_s3 + $0x1b8] sm:$0xff]  ;;  %v3159_v51 = vpack.c.bf16 %v417_v40, %v413_v39  ;;  %v419_v52 = vld [vmem:[%s3639_s3 + $0x180] sm:$0xff]  ;;  %v57_v23 = vsub.s32 0, %v56_v22  ;;  %v61_v26 = vsub.s32 1, %v56_v22  ;;  %v69_v30 = vsub.s32 3, %v56_v22 }
  0x1a   :  { %1984 = vmatmul.mubr.msk.f32.gmra.mrb[6].mxu1 %vm75_vm3, %v32_v14  ;;  %2107 = vmatpush1.bf16.msra.mxu0 %v3063_v15  ;;  %v34_v45 = vld [vmem:[%s3640_s0 + $0x28] sm:$0xff]  ;;  %v423_v53 = vld [vmem:[%s3639_s3 + $0x1a0] sm:$0xff]  ;;  %v3169_v55 = vpack.c.bf16 %v424_v44, %v420_v43  ;;  %v421_v56 = vld [vmem:[%s3639_s3 + $0x190] sm:$0xff]  ;;  %v3179_v59 = vpack.c.bf16 %v426_v49, %v422_v48  ;;  %v65_v44 = vsub.s32 2, %v56_v22 }
  0x1b   :  { %2139 = vmatpush1.bf16.msra.mxu1 %v3073_v18  ;;  %201 = vmatprep.mubr.f32.mxu0 %v2788_v3  ;;  %v425_v57 = vld [vmem:[%s3639_s3 + $0x1b0] sm:$0xff]  ;;  %v428_v60 = vld [vmem:[%s3639_s3 + $0x1c8] sm:$0xff]  ;;  %v3192_v0 = vpack.c.bf16 %v423_v53, %v419_v52  ;;  %v430_v2 = vld [vmem:[%s3639_s3 + $0x1d8] sm:$0xff] }
  0x1c   :  { %314 = vmatprep.mubr.f32.mxu1 %v2788_v3  ;;  %2109 = vmatprep.subr.bf16.mxu0 %v3083_v21  ;;  %v432_v62 = vld [vmem:[%s3639_s3 + $0x1e8] sm:$0xff]  ;;  %v35_v63 = vld [vmem:[%s3640_s0 + $0x30] sm:$0xff]  ;;  %v434_v4 = vld [vmem:[%s3639_s3 + $0x1f8] sm:$0xff]  ;;  %v3202_v6 = vpack.c.bf16 %v425_v57, %v421_v56 }
  0x1d   :  { %1975 = vmatmul.mubr.msk.f32.gmra.mrb[8].mxu0 %vm75_vm3, %v33_v27  ;;  %2141 = vmatprep.subr.bf16.mxu1 %v3093_v24  ;;  %v427_v7 = vld [vmem:[%s3639_s3 + $0x1c0] sm:$0xff]  ;;  %v3212_v10 = vpack.c.bf16 %v432_v62, %v428_v60  ;;  %v429_v12 = vld [vmem:[%s3639_s3 + $0x1d0] sm:$0xff]  ;;  %v3222_v14 = vpack.c.bf16 %v434_v4, %v430_v2  ;;  %v36_v16 = vld [vmem:[%s3640_s0 + $0x38] sm:$0xff] }
  0x1e   :  { %1985 = vmatmul.mubr.msk.f32.gmra.mrb[8].mxu1 %vm75_vm3, %v33_v27  ;;  %2111 = vmatpush1.bf16.msra.mxu0 %v3106_v28  ;;  %v431_v9 = vld [vmem:[%s3639_s3 + $0x1e0] sm:$0xff]  ;;  %v433_v13 = vld [vmem:[%s3639_s3 + $0x1f0] sm:$0xff] }
  0x1f   :  { %2143 = vmatpush1.bf16.msra.mxu1 %v3116_v32  ;;  %207 = vmatprep.mubr.f32.mxu0 %v2788_v3  ;;  %v3229_v17 = vpack.c.bf16 %v431_v9, %v427_v7  ;;  %v3233_v19 = vpack.c.bf16 %v433_v13, %v429_v12  ;;  %v53_v25 = vld [vmem:[%s3641_s2] sm:$0xf] }
  0x20   :  { %320 = vmatprep.mubr.f32.mxu1 %v2788_v3  ;;  %2113 = vmatprep.subr.bf16.mxu0 %v3126_v37  ;;  %v3285_v27 = vrot.slane %v53_v25, %v57_v23  ;;  %v3287_v31 = vrot.slane %v53_v25, %v61_v26  ;;  %v3290_v43 = vrot.slane %v53_v25, %v69_v30 }
  0x21   :  { %1976 = vmatmul.mubr.msk.f32.gmra.mrb[10].mxu0 %vm75_vm3, %v34_v45  ;;  %2145 = vmatprep.subr.bf16.mxu1 %v3136_v41  ;;  %v3294_v56 = vrot.slane %v53_v25, %v65_v44 }
  0x22   :  { %1986 = vmatmul.mubr.msk.f32.gmra.mrb[10].mxu1 %vm75_vm3, %v34_v45  ;;  %2115 = vmatpush1.bf16.msra.mxu0 %v3149_v46 }
  0x23   :  { %2147 = vmatpush1.bf16.msra.mxu1 %v3159_v51  ;;  %213 = vmatprep.mubr.f32.mxu0 %v2788_v3 }
  0x24   :  { %326 = vmatprep.mubr.f32.mxu1 %v2788_v3  ;;  %2117 = vmatprep.subr.bf16.mxu0 %v3169_v55 }
  0x25   :  { %1977 = vmatmul.mubr.msk.f32.gmra.mrb[12].mxu0 %vm75_vm3, %v35_v63  ;;  %2149 = vmatprep.subr.bf16.mxu1 %v3179_v59 }
  0x26   :  { %1987 = vmatmul.mubr.msk.f32.gmra.mrb[12].mxu1 %vm75_vm3, %v35_v63  ;;  %2119 = vmatpush1.bf16.msra.mxu0 %v3192_v0 }
  0x27   :  { %2151 = vmatpush1.bf16.msra.mxu1 %v3202_v6  ;;  %219 = vmatprep.mubr.f32.mxu0 %v2788_v3 }
  0x28   :  { %332 = vmatprep.mubr.f32.mxu1 %v2788_v3  ;;  %2121 = vmatprep.subr.bf16.mxu0 %v3212_v10 }
  0x29   :  { %1978 = vmatmul.mubr.msk.f32.gmra.mrb[14].mxu0 %vm75_vm3, %v36_v16  ;;  %2153 = vmatprep.subr.bf16.mxu1 %v3222_v14 }
  0x2a   :  { %1988 = vmatmul.mubr.msk.f32.gmra.mrb[14].mxu1 %vm75_vm3, %v36_v16  ;;  %2123 = vmatpush1.bf16.msra.mxu0 %v3229_v17 }
  0x2b   :  { %2155 = vmatpush1.bf16.msra.mxu1 %v3233_v19  ;;  %503 = vmatprep.mubr.f32.mxu0 %v2788_v3 }
  0x2c   :  { %574 = vmatprep.mubr.f32.mxu1 %v2788_v3  ;;  %2157 = vmatprep.subr.bf16.mxu0 %v2905_v29 }
  0x2d   :  { %504 = vmatmul.mubr.f32.vlgmr.msra.gmra.mrb[0].mxu0 %v2788_v3  ;;  %2189 = vmatprep.subr.bf16.mxu1 %v2921_v34 }
  0x2e   :  { %575 = vmatmul.mubr.f32.vlgmr.msra.gmra.mrb[0].mxu1 %v2788_v3  ;;  %2159 = vmatpush1.bf16.msra.mxu0 %v2923_v35 }
  0x2f   :  { %2191 = vmatpush1.bf16.msra.mxu1 %v2934_v38  ;;  %2161 = vmatprep.subr.bf16.mxu0 %v2946_v42 }
  0x30   :  { %2193 = vmatprep.subr.bf16.mxu1 %v2961_v47  ;;  %671 = vmatprep.mubr.f32.mxu0 %v2788_v3 }
  0x31   :  { %742 = vmatprep.mubr.f32.mxu1 %v2788_v3 }
  0x32   :  { %2163 = vmatpush1.bf16.msra.mxu0 %v2971_v50 }
  0x33   :  { %2195 = vmatpush1.bf16.msra.mxu1 %v2984_v54  ;;  %2165 = vmatprep.subr.bf16.mxu0 %v2997_v58 }
  0x34   :  { %2197 = vmatprep.subr.bf16.mxu1 %v3007_v61 }
  0x36   :  { %2167 = vmatpush1.bf16.msra.mxu0 %v3020_v1 }
  0x37   :  { %2199 = vmatpush1.bf16.msra.mxu1 %v3030_v5  ;;  %2169 = vmatprep.subr.bf16.mxu0 %v3040_v8 }
  0x38   :  { %2201 = vmatprep.subr.bf16.mxu1 %v3050_v11 }
  0x3a   :  { %2171 = vmatpush1.bf16.msra.mxu0 %v3063_v15 }
  0x3b   :  { %2203 = vmatpush1.bf16.msra.mxu1 %v3073_v18  ;;  %2173 = vmatprep.subr.bf16.mxu0 %v3083_v21 }
  0x3c   :  { %2205 = vmatprep.subr.bf16.mxu1 %v3093_v24 }
  0x3e   :  { %2175 = vmatpush1.bf16.msra.mxu0 %v3106_v28 }
  0x3f   :  { %2207 = vmatpush1.bf16.msra.mxu1 %v3116_v32  ;;  %2177 = vmatprep.subr.bf16.mxu0 %v3126_v37 }
  0x40   :  { %2209 = vmatprep.subr.bf16.mxu1 %v3136_v41 }
  0x42   :  { %2179 = vmatpush1.bf16.msra.mxu0 %v3149_v46 }
  0x43   :  { %2211 = vmatpush1.bf16.msra.mxu1 %v3159_v51  ;;  %2181 = vmatprep.subr.bf16.mxu0 %v3169_v55 }
  0x44   :  { %2213 = vmatprep.subr.bf16.mxu1 %v3179_v59 }
  0x46   :  { %2183 = vmatpush1.bf16.msra.mxu0 %v3192_v0 }
  0x47   :  { %2215 = vmatpush1.bf16.msra.mxu1 %v3202_v6  ;;  %2185 = vmatprep.subr.bf16.mxu0 %v3212_v10 }
  0x48   :  { %2217 = vmatprep.subr.bf16.mxu1 %v3222_v14 }
  0x4a   :  { %2187 = vmatpush1.bf16.msra.mxu0 %v3229_v17 }
  0x4b   :  { %2219 = vmatpush1.bf16.msra.mxu1 %v3233_v19  ;;  %2221 = vmatprep.subr.bf16.mxu0 %v2905_v29 }
  0x4c   :  { %2253 = vmatprep.subr.bf16.mxu1 %v2921_v34 }
 0x100   :  { %v505_v33 = vpop.f32.mrb[0].mxu0 }
 0x101   :  { %v2640_v36 = vadd.f32 %v505_v33, %v3285_v27  ;;  %v576_v39 = vpop.f32.mrb[0].mxu1  ;;  %v507_v40 = vpop.f32.mrb[1].mxu0 }
 0x102   :  { %v2641_v45 = vadd.f32 %v507_v40, %v3287_v31  ;;  %v578_v48 = vpop.f32.mrb[1].mxu1  ;;  %v2656_v57 = vadd.f32 %v576_v39, %v3294_v56 }
 0x103   :  { %v585_v49 = vmul.f32 0.5, %v2640_v36  ;;  %v2657_v53 = vadd.f32 %v578_v48, %v3290_v43 }
 0x104   :  { %v586_v52 = vmul.f32 0.5, %v2641_v45  ;;  %v587_v60 = vmul.f32 0.5, %v2656_v57 }
 0x105   :  { %2708 = vtanh.f32 %v585_v49 }
 0x106   :  { %2710 = vtanh.f32 %v586_v52 }
 0x107   :  { %2712 = vtanh.f32 %v2657_v53 }
 0x108   :  { %2714 = vtanh.f32 %v587_v60 }
 0x10f   :  { %v2709_v62 = vpop.eup %2708 }
 0x110   :  { %v591_v63 = vadd.f32 1.0, %v2709_v62  ;;  %v2711_v2 = vpop.eup %2710 }
 0x111   :  { %v592_v7 = vadd.f32 1.0, %v2711_v2  ;;  %v2713_v9 = vpop.eup %2712 }
 0x112   :  { %v594_v4 = vmul.f32 0.5, %v591_v63  ;;  %v2715_v22 = vpop.eup %2714 }
 0x113   :  { %v595_v12 = vmul.f32 0.5, %v592_v7  ;;  %v593_v23 = vadd.f32 1.0, %v2715_v22 }
 0x114   :  { %v599_v13 = vmul.f32 %v2713_v9, %v594_v4 }
 0x115   :  { %v598_v16 = vmul.f32 0.0, %v595_v12  ;;  %v596_v25 = vmul.f32 0.5, %v593_v23 }
 0x117   :  { %v3297_v20 = vadd.f32 %v599_v13, %v598_v16 }
 0x119   :  { %2716 = vtanh.f32 %v3297_v20 }
 0x123   :  { %v2717_v26 = vpop.eup %2716 }
 0x124   :  { %v602_v30 = vmul.f32 %v2717_v26, %v596_v25 }
 0x126   :  { %672 = vmatmul.mubr.f32.vlgmr.msra.gmra.mrb[2].mxu0 %v602_v30  ;;  %743 = vmatmul.mubr.f32.vlgmr.msra.gmra.mrb[2].mxu1 %v602_v30 }
 0x127   :  { %2223 = vmatpush1.bf16.msra.mxu0 %v2923_v35  ;;  %2255 = vmatpush1.bf16.msra.mxu1 %v2934_v38 }
 0x128   :  { %2225 = vmatprep.subr.bf16.mxu0 %v2946_v42  ;;  %2257 = vmatprep.subr.bf16.mxu1 %v2961_v47 }
 0x129   :  { %839 = vmatprep.mubr.f32.mxu0 %v2788_v3  ;;  %910 = vmatprep.mubr.f32.mxu1 %v2788_v3 }
 0x12b   :  { %2227 = vmatpush1.bf16.msra.mxu0 %v2971_v50  ;;  %2259 = vmatpush1.bf16.msra.mxu1 %v2984_v54 }
 0x12c   :  { %2229 = vmatprep.subr.bf16.mxu0 %v2997_v58  ;;  %2261 = vmatprep.subr.bf16.mxu1 %v3007_v61 }
 0x12f   :  { %2231 = vmatpush1.bf16.msra.mxu0 %v3020_v1  ;;  %2263 = vmatpush1.bf16.msra.mxu1 %v3030_v5 }
 0x130   :  { %2233 = vmatprep.subr.bf16.mxu0 %v3040_v8  ;;  %2265 = vmatprep.subr.bf16.mxu1 %v3050_v11 }
 0x133   :  { %2235 = vmatpush1.bf16.msra.mxu0 %v3063_v15  ;;  %2267 = vmatpush1.bf16.msra.mxu1 %v3073_v18 }
 0x134   :  { %2237 = vmatprep.subr.bf16.mxu0 %v3083_v21  ;;  %2269 = vmatprep.subr.bf16.mxu1 %v3093_v24 }
 0x137   :  { %2239 = vmatpush1.bf16.msra.mxu0 %v3106_v28  ;;  %2271 = vmatpush1.bf16.msra.mxu1 %v3116_v32 }
 0x138   :  { %2241 = vmatprep.subr.bf16.mxu0 %v3126_v37  ;;  %2273 = vmatprep.subr.bf16.mxu1 %v3136_v41 }
 0x13b   :  { %2243 = vmatpush1.bf16.msra.mxu0 %v3149_v46  ;;  %2275 = vmatpush1.bf16.msra.mxu1 %v3159_v51 }
 0x13c   :  { %2245 = vmatprep.subr.bf16.mxu0 %v3169_v55  ;;  %2277 = vmatprep.subr.bf16.mxu1 %v3179_v59 }
 0x13f   :  { %2247 = vmatpush1.bf16.msra.mxu0 %v3192_v0  ;;  %2279 = vmatpush1.bf16.msra.mxu1 %v3202_v6 }
 0x140   :  { %2249 = vmatprep.subr.bf16.mxu0 %v3212_v10  ;;  %2281 = vmatprep.subr.bf16.mxu1 %v3222_v14 }
 0x143   :  { %2251 = vmatpush1.bf16.msra.mxu0 %v3229_v17  ;;  %2283 = vmatpush1.bf16.msra.mxu1 %v3233_v19 }
 0x144   :  { %2285 = vmatprep.subr.bf16.mxu0 %v2905_v29  ;;  %2317 = vmatprep.subr.bf16.mxu1 %v2921_v34 }
 0x1f9   :  { %v673_v33 = vpop.f32.mrb[2].mxu0  ;;  %v744_v36 = vpop.f32.mrb[2].mxu1 }
 0x1fa   :  { %v2642_v39 = vadd.f32 %v673_v33, %v3285_v27  ;;  %v675_v40 = vpop.f32.mrb[3].mxu0  ;;  %v746_v44 = vpop.f32.mrb[3].mxu1  ;;  %v2658_v53 = vadd.f32 %v744_v36, %v3294_v56 }
 0x1fb   :  { %v2643_v45 = vadd.f32 %v675_v40, %v3287_v31  ;;  %v2659_v52 = vadd.f32 %v746_v44, %v3290_v43 }
 0x1fc   :  { %v753_v48 = vmul.f32 0.5, %v2642_v39  ;;  %v755_v57 = vmul.f32 0.5, %v2658_v53 }
 0x1fd   :  { %v754_v49 = vmul.f32 0.5, %v2643_v45 }
 0x1fe   :  { %2718 = vtanh.f32 %v753_v48 }
 0x1ff   :  { %2720 = vtanh.f32 %v754_v49 }
 0x200   :  { %2722 = vtanh.f32 %v2659_v52 }
 0x201   :  { %2724 = vtanh.f32 %v755_v57 }
 0x208   :  { %v2719_v60 = vpop.eup %2718 }
 0x209   :  { %v759_v62 = vadd.f32 1.0, %v2719_v60  ;;  %v2721_v63 = vpop.eup %2720 }
 0x20a   :  { %v760_v4 = vadd.f32 1.0, %v2721_v63  ;;  %v2723_v7 = vpop.eup %2722 }
 0x20b   :  { %v762_v2 = vmul.f32 0.5, %v759_v62  ;;  %v2725_v22 = vpop.eup %2724 }
 0x20c   :  { %v763_v9 = vmul.f32 0.5, %v760_v4  ;;  %v761_v23 = vadd.f32 1.0, %v2725_v22 }
 0x20d   :  { %v767_v12 = vmul.f32 %v2723_v7, %v762_v2 }
 0x20e   :  { %v766_v13 = vmul.f32 %v763_v9, %v3297_v20  ;;  %v764_v25 = vmul.f32 0.5, %v761_v23 }
 0x210   :  { %v3339_v16 = vadd.f32 %v767_v12, %v766_v13 }
 0x212   :  { %2726 = vtanh.f32 %v3339_v16 }
 0x21c   :  { %v2727_v26 = vpop.eup %2726 }
 0x21d   :  { %v770_v30 = vmul.f32 %v2727_v26, %v764_v25 }
 0x21f   :  { %840 = vmatmul.mubr.f32.vlgmr.msra.gmra.mrb[4].mxu0 %v770_v30  ;;  %911 = vmatmul.mubr.f32.vlgmr.msra.gmra.mrb[4].mxu1 %v770_v30 }
 0x220   :  { %2287 = vmatpush1.bf16.msra.mxu0 %v2923_v35  ;;  %2319 = vmatpush1.bf16.msra.mxu1 %v2934_v38 }
 0x221   :  { %2289 = vmatprep.subr.bf16.mxu0 %v2946_v42  ;;  %2321 = vmatprep.subr.bf16.mxu1 %v2961_v47 }
 0x222   :  { %1007 = vmatprep.mubr.f32.mxu0 %v2788_v3  ;;  %1078 = vmatprep.mubr.f32.mxu1 %v2788_v3 }
 0x224   :  { %2291 = vmatpush1.bf16.msra.mxu0 %v2971_v50  ;;  %2323 = vmatpush1.bf16.msra.mxu1 %v2984_v54 }
 0x225   :  { %2293 = vmatprep.subr.bf16.mxu0 %v2997_v58  ;;  %2325 = vmatprep.subr.bf16.mxu1 %v3007_v61 }
 0x228   :  { %2295 = vmatpush1.bf16.msra.mxu0 %v3020_v1  ;;  %2327 = vmatpush1.bf16.msra.mxu1 %v3030_v5 }
 0x229   :  { %2297 = vmatprep.subr.bf16.mxu0 %v3040_v8  ;;  %2329 = vmatprep.subr.bf16.mxu1 %v3050_v11 }
 0x22c   :  { %2299 = vmatpush1.bf16.msra.mxu0 %v3063_v15  ;;  %2331 = vmatpush1.bf16.msra.mxu1 %v3073_v18 }
 0x22d   :  { %2301 = vmatprep.subr.bf16.mxu0 %v3083_v21  ;;  %2333 = vmatprep.subr.bf16.mxu1 %v3093_v24 }
 0x230   :  { %2303 = vmatpush1.bf16.msra.mxu0 %v3106_v28  ;;  %2335 = vmatpush1.bf16.msra.mxu1 %v3116_v32 }
 0x231   :  { %2305 = vmatprep.subr.bf16.mxu0 %v3126_v37  ;;  %2337 = vmatprep.subr.bf16.mxu1 %v3136_v41 }
 0x234   :  { %2307 = vmatpush1.bf16.msra.mxu0 %v3149_v46  ;;  %2339 = vmatpush1.bf16.msra.mxu1 %v3159_v51 }
 0x235   :  { %2309 = vmatprep.subr.bf16.mxu0 %v3169_v55  ;;  %2341 = vmatprep.subr.bf16.mxu1 %v3179_v59 }
 0x238   :  { %2311 = vmatpush1.bf16.msra.mxu0 %v3192_v0  ;;  %2343 = vmatpush1.bf16.msra.mxu1 %v3202_v6 }
 0x239   :  { %2313 = vmatprep.subr.bf16.mxu0 %v3212_v10  ;;  %2345 = vmatprep.subr.bf16.mxu1 %v3222_v14 }
 0x23c   :  { %2315 = vmatpush1.bf16.msra.mxu0 %v3229_v17  ;;  %2347 = vmatpush1.bf16.msra.mxu1 %v3233_v19 }
 0x23d   :  { %2349 = vmatprep.subr.bf16.mxu0 %v2905_v29  ;;  %2381 = vmatprep.subr.bf16.mxu1 %v2921_v34 }
 0x2f2   :  { %v841_v20 = vpop.f32.mrb[4].mxu0  ;;  %v912_v33 = vpop.f32.mrb[4].mxu1 }
 0x2f3   :  { %v2644_v36 = vadd.f32 %v841_v20, %v3285_v27  ;;  %v843_v39 = vpop.f32.mrb[5].mxu0  ;;  %v914_v40 = vpop.f32.mrb[5].mxu1  ;;  %v2660_v52 = vadd.f32 %v912_v33, %v3294_v56 }
 0x2f4   :  { %v2645_v44 = vadd.f32 %v843_v39, %v3287_v31  ;;  %v2661_v49 = vadd.f32 %v914_v40, %v3290_v43 }
 0x2f5   :  { %v921_v45 = vmul.f32 0.5, %v2644_v36  ;;  %v923_v53 = vmul.f32 0.5, %v2660_v52 }
 0x2f6   :  { %v922_v48 = vmul.f32 0.5, %v2645_v44 }
 0x2f7   :  { %2728 = vtanh.f32 %v921_v45 }
 0x2f8   :  { %2730 = vtanh.f32 %v922_v48 }
 0x2f9   :  { %2732 = vtanh.f32 %v2661_v49 }
 0x2fa   :  { %2734 = vtanh.f32 %v923_v53 }
 0x301   :  { %v2729_v57 = vpop.eup %2728 }
 0x302   :  { %v927_v60 = vadd.f32 1.0, %v2729_v57  ;;  %v2731_v62 = vpop.eup %2730 }
 0x303   :  { %v928_v2 = vadd.f32 1.0, %v2731_v62  ;;  %v2733_v4 = vpop.eup %2732 }
 0x304   :  { %v930_v63 = vmul.f32 0.5, %v927_v60  ;;  %v2735_v22 = vpop.eup %2734 }
 0x305   :  { %v931_v7 = vmul.f32 0.5, %v928_v2  ;;  %v929_v23 = vadd.f32 1.0, %v2735_v22 }
 0x306   :  { %v935_v9 = vmul.f32 %v2733_v4, %v930_v63 }
 0x307   :  { %v934_v12 = vmul.f32 %v931_v7, %v3339_v16  ;;  %v932_v25 = vmul.f32 0.5, %v929_v23 }
 0x309   :  { %v3381_v13 = vadd.f32 %v935_v9, %v934_v12 }
 0x30b   :  { %2736 = vtanh.f32 %v3381_v13 }
 0x315   :  { %v2737_v26 = vpop.eup %2736 }
 0x316   :  { %v938_v30 = vmul.f32 %v2737_v26, %v932_v25 }
 0x318   :  { %1008 = vmatmul.mubr.f32.vlgmr.msra.gmra.mrb[6].mxu0 %v938_v30  ;;  %1079 = vmatmul.mubr.f32.vlgmr.msra.gmra.mrb[6].mxu1 %v938_v30 }
 0x319   :  { %2351 = vmatpush1.bf16.msra.mxu0 %v2923_v35  ;;  %2383 = vmatpush1.bf16.msra.mxu1 %v2934_v38 }
 0x31a   :  { %2353 = vmatprep.subr.bf16.mxu0 %v2946_v42  ;;  %2385 = vmatprep.subr.bf16.mxu1 %v2961_v47 }
 0x31b   :  { %1175 = vmatprep.mubr.f32.mxu0 %v2788_v3  ;;  %1246 = vmatprep.mubr.f32.mxu1 %v2788_v3 }
 0x31d   :  { %2355 = vmatpush1.bf16.msra.mxu0 %v2971_v50  ;;  %2387 = vmatpush1.bf16.msra.mxu1 %v2984_v54 }
 0x31e   :  { %2357 = vmatprep.subr.bf16.mxu0 %v2997_v58  ;;  %2389 = vmatprep.subr.bf16.mxu1 %v3007_v61 }
 0x321   :  { %2359 = vmatpush1.bf16.msra.mxu0 %v3020_v1  ;;  %2391 = vmatpush1.bf16.msra.mxu1 %v3030_v5 }
 0x322   :  { %2361 = vmatprep.subr.bf16.mxu0 %v3040_v8  ;;  %2393 = vmatprep.subr.bf16.mxu1 %v3050_v11 }
 0x325   :  { %2363 = vmatpush1.bf16.msra.mxu0 %v3063_v15  ;;  %2395 = vmatpush1.bf16.msra.mxu1 %v3073_v18 }
 0x326   :  { %2365 = vmatprep.subr.bf16.mxu0 %v3083_v21  ;;  %2397 = vmatprep.subr.bf16.mxu1 %v3093_v24 }
 0x329   :  { %2367 = vmatpush1.bf16.msra.mxu0 %v3106_v28  ;;  %2399 = vmatpush1.bf16.msra.mxu1 %v3116_v32 }
 0x32a   :  { %2369 = vmatprep.subr.bf16.mxu0 %v3126_v37  ;;  %2401 = vmatprep.subr.bf16.mxu1 %v3136_v41 }
 0x32d   :  { %2371 = vmatpush1.bf16.msra.mxu0 %v3149_v46  ;;  %2403 = vmatpush1.bf16.msra.mxu1 %v3159_v51 }
 0x32e   :  { %2373 = vmatprep.subr.bf16.mxu0 %v3169_v55  ;;  %2405 = vmatprep.subr.bf16.mxu1 %v3179_v59 }
 0x331   :  { %2375 = vmatpush1.bf16.msra.mxu0 %v3192_v0  ;;  %2407 = vmatpush1.bf16.msra.mxu1 %v3202_v6 }
 0x332   :  { %2377 = vmatprep.subr.bf16.mxu0 %v3212_v10  ;;  %2409 = vmatprep.subr.bf16.mxu1 %v3222_v14 }
 0x335   :  { %2379 = vmatpush1.bf16.msra.mxu0 %v3229_v17  ;;  %2411 = vmatpush1.bf16.msra.mxu1 %v3233_v19 }
 0x336   :  { %2413 = vmatprep.subr.bf16.mxu0 %v2905_v29  ;;  %2445 = vmatprep.subr.bf16.mxu1 %v2921_v34 }
 0x3eb   :  { %v1009_v16 = vpop.f32.mrb[6].mxu0  ;;  %v1080_v20 = vpop.f32.mrb[6].mxu1 }
 0x3ec   :  { %v2646_v33 = vadd.f32 %v1009_v16, %v3285_v27  ;;  %v1011_v36 = vpop.f32.mrb[7].mxu0  ;;  %v1082_v39 = vpop.f32.mrb[7].mxu1  ;;  %v2662_v49 = vadd.f32 %v1080_v20, %v3294_v56 }
 0x3ed   :  { %v2647_v40 = vadd.f32 %v1011_v36, %v3287_v31  ;;  %v2663_v48 = vadd.f32 %v1082_v39, %v3290_v43 }
 0x3ee   :  { %v1089_v44 = vmul.f32 0.5, %v2646_v33  ;;  %v1091_v52 = vmul.f32 0.5, %v2662_v49 }
 0x3ef   :  { %v1090_v45 = vmul.f32 0.5, %v2647_v40 }
 0x3f0   :  { %2738 = vtanh.f32 %v1089_v44 }
 0x3f1   :  { %2740 = vtanh.f32 %v1090_v45 }
 0x3f2   :  { %2742 = vtanh.f32 %v2663_v48 }
 0x3f3   :  { %2744 = vtanh.f32 %v1091_v52 }
 0x3fa   :  { %v2739_v53 = vpop.eup %2738 }
 0x3fb   :  { %v1095_v57 = vadd.f32 1.0, %v2739_v53  ;;  %v2741_v60 = vpop.eup %2740 }
 0x3fc   :  { %v1096_v63 = vadd.f32 1.0, %v2741_v60  ;;  %v2743_v2 = vpop.eup %2742 }
 0x3fd   :  { %v1098_v62 = vmul.f32 0.5, %v1095_v57  ;;  %v2745_v22 = vpop.eup %2744 }
 0x3fe   :  { %v1099_v4 = vmul.f32 0.5, %v1096_v63  ;;  %v1097_v23 = vadd.f32 1.0, %v2745_v22 }
 0x3ff   :  { %v1103_v7 = vmul.f32 %v2743_v2, %v1098_v62 }
 0x400   :  { %v1102_v9 = vmul.f32 %v1099_v4, %v3381_v13  ;;  %v1100_v25 = vmul.f32 0.5, %v1097_v23 }
 0x402   :  { %v3423_v12 = vadd.f32 %v1103_v7, %v1102_v9 }
 0x404   :  { %2746 = vtanh.f32 %v3423_v12 }
 0x40e   :  { %v2747_v26 = vpop.eup %2746 }
 0x40f   :  { %v1106_v30 = vmul.f32 %v2747_v26, %v1100_v25 }
 0x411   :  { %1176 = vmatmul.mubr.f32.vlgmr.msra.gmra.mrb[8].mxu0 %v1106_v30  ;;  %1247 = vmatmul.mubr.f32.vlgmr.msra.gmra.mrb[8].mxu1 %v1106_v30 }
 0x412   :  { %2415 = vmatpush1.bf16.msra.mxu0 %v2923_v35  ;;  %2447 = vmatpush1.bf16.msra.mxu1 %v2934_v38 }
 0x413   :  { %2417 = vmatprep.subr.bf16.mxu0 %v2946_v42  ;;  %2449 = vmatprep.subr.bf16.mxu1 %v2961_v47 }
 0x414   :  { %1343 = vmatprep.mubr.f32.mxu0 %v2788_v3  ;;  %1414 = vmatprep.mubr.f32.mxu1 %v2788_v3 }
 0x416   :  { %2419 = vmatpush1.bf16.msra.mxu0 %v2971_v50  ;;  %2451 = vmatpush1.bf16.msra.mxu1 %v2984_v54 }
 0x417   :  { %2421 = vmatprep.subr.bf16.mxu0 %v2997_v58  ;;  %2453 = vmatprep.subr.bf16.mxu1 %v3007_v61 }
 0x41a   :  { %2423 = vmatpush1.bf16.msra.mxu0 %v3020_v1  ;;  %2455 = vmatpush1.bf16.msra.mxu1 %v3030_v5 }
 0x41b   :  { %2425 = vmatprep.subr.bf16.mxu0 %v3040_v8  ;;  %2457 = vmatprep.subr.bf16.mxu1 %v3050_v11 }
 0x41e   :  { %2427 = vmatpush1.bf16.msra.mxu0 %v3063_v15  ;;  %2459 = vmatpush1.bf16.msra.mxu1 %v3073_v18 }
 0x41f   :  { %2429 = vmatprep.subr.bf16.mxu0 %v3083_v21  ;;  %2461 = vmatprep.subr.bf16.mxu1 %v3093_v24 }
 0x422   :  { %2431 = vmatpush1.bf16.msra.mxu0 %v3106_v28  ;;  %2463 = vmatpush1.bf16.msra.mxu1 %v3116_v32 }
 0x423   :  { %2433 = vmatprep.subr.bf16.mxu0 %v3126_v37  ;;  %2465 = vmatprep.subr.bf16.mxu1 %v3136_v41 }
 0x426   :  { %2435 = vmatpush1.bf16.msra.mxu0 %v3149_v46  ;;  %2467 = vmatpush1.bf16.msra.mxu1 %v3159_v51 }
 0x427   :  { %2437 = vmatprep.subr.bf16.mxu0 %v3169_v55  ;;  %2469 = vmatprep.subr.bf16.mxu1 %v3179_v59 }
 0x42a   :  { %2439 = vmatpush1.bf16.msra.mxu0 %v3192_v0  ;;  %2471 = vmatpush1.bf16.msra.mxu1 %v3202_v6 }
 0x42b   :  { %2441 = vmatprep.subr.bf16.mxu0 %v3212_v10  ;;  %2473 = vmatprep.subr.bf16.mxu1 %v3222_v14 }
 0x42e   :  { %2443 = vmatpush1.bf16.msra.mxu0 %v3229_v17  ;;  %2475 = vmatpush1.bf16.msra.mxu1 %v3233_v19 }
 0x42f   :  { %2477 = vmatprep.subr.bf16.mxu0 %v2905_v29  ;;  %2509 = vmatprep.subr.bf16.mxu1 %v2921_v34 }
 0x4e4   :  { %v1177_v13 = vpop.f32.mrb[8].mxu0  ;;  %v1248_v16 = vpop.f32.mrb[8].mxu1 }
 0x4e5   :  { %v2648_v20 = vadd.f32 %v1177_v13, %v3285_v27  ;;  %v1179_v33 = vpop.f32.mrb[9].mxu0  ;;  %v1250_v36 = vpop.f32.mrb[9].mxu1  ;;  %v2664_v48 = vadd.f32 %v1248_v16, %v3294_v56 }
 0x4e6   :  { %v2649_v39 = vadd.f32 %v1179_v33, %v3287_v31  ;;  %v2665_v45 = vadd.f32 %v1250_v36, %v3290_v43 }
 0x4e7   :  { %v1257_v40 = vmul.f32 0.5, %v2648_v20  ;;  %v1259_v49 = vmul.f32 0.5, %v2664_v48 }
 0x4e8   :  { %v1258_v44 = vmul.f32 0.5, %v2649_v39 }
 0x4e9   :  { %2748 = vtanh.f32 %v1257_v40 }
 0x4ea   :  { %2750 = vtanh.f32 %v1258_v44 }
 0x4eb   :  { %2752 = vtanh.f32 %v2665_v45 }
 0x4ec   :  { %2754 = vtanh.f32 %v1259_v49 }
 0x4f3   :  { %v2749_v52 = vpop.eup %2748 }
 0x4f4   :  { %v1263_v53 = vadd.f32 1.0, %v2749_v52  ;;  %v2751_v57 = vpop.eup %2750 }
 0x4f5   :  { %v1264_v62 = vadd.f32 1.0, %v2751_v57  ;;  %v2753_v63 = vpop.eup %2752 }
 0x4f6   :  { %v1266_v60 = vmul.f32 0.5, %v1263_v53  ;;  %v2755_v22 = vpop.eup %2754 }
 0x4f7   :  { %v1267_v2 = vmul.f32 0.5, %v1264_v62  ;;  %v1265_v23 = vadd.f32 1.0, %v2755_v22 }
 0x4f8   :  { %v1271_v4 = vmul.f32 %v2753_v63, %v1266_v60 }
 0x4f9   :  { %v1270_v7 = vmul.f32 %v1267_v2, %v3423_v12  ;;  %v1268_v25 = vmul.f32 0.5, %v1265_v23 }
 0x4fb   :  { %v3465_v9 = vadd.f32 %v1271_v4, %v1270_v7 }
 0x4fd   :  { %2756 = vtanh.f32 %v3465_v9 }
 0x507   :  { %v2757_v26 = vpop.eup %2756 }
 0x508   :  { %v1274_v30 = vmul.f32 %v2757_v26, %v1268_v25  ;;  %v1783_v26 = vld [vmem:[%s3642_s4 + $0x18] sm:$0xff] }
 0x50a   :  { %1344 = vmatmul.mubr.f32.vlgmr.msra.gmra.mrb[10].mxu0 %v1274_v30  ;;  %1415 = vmatmul.mubr.f32.vlgmr.msra.gmra.mrb[10].mxu1 %v1274_v30 }
 0x50b   :  { %2479 = vmatpush1.bf16.msra.mxu0 %v2923_v35  ;;  %2511 = vmatpush1.bf16.msra.mxu1 %v2934_v38 }
 0x50c   :  { %2481 = vmatprep.subr.bf16.mxu0 %v2946_v42  ;;  %2513 = vmatprep.subr.bf16.mxu1 %v2961_v47 }
 0x50d   :  { %1511 = vmatprep.mubr.f32.mxu0 %v2788_v3  ;;  %1582 = vmatprep.mubr.f32.mxu1 %v2788_v3 }
 0x50f   :  { %2483 = vmatpush1.bf16.msra.mxu0 %v2971_v50  ;;  %2515 = vmatpush1.bf16.msra.mxu1 %v2984_v54 }
 0x510   :  { %2485 = vmatprep.subr.bf16.mxu0 %v2997_v58  ;;  %2517 = vmatprep.subr.bf16.mxu1 %v3007_v61 }
 0x513   :  { %2487 = vmatpush1.bf16.msra.mxu0 %v3020_v1  ;;  %2519 = vmatpush1.bf16.msra.mxu1 %v3030_v5 }
 0x514   :  { %2489 = vmatprep.subr.bf16.mxu0 %v3040_v8  ;;  %2521 = vmatprep.subr.bf16.mxu1 %v3050_v11 }
 0x517   :  { %2491 = vmatpush1.bf16.msra.mxu0 %v3063_v15  ;;  %2523 = vmatpush1.bf16.msra.mxu1 %v3073_v18 }
 0x518   :  { %2493 = vmatprep.subr.bf16.mxu0 %v3083_v21  ;;  %2525 = vmatprep.subr.bf16.mxu1 %v3093_v24 }
 0x51b   :  { %2495 = vmatpush1.bf16.msra.mxu0 %v3106_v28  ;;  %2527 = vmatpush1.bf16.msra.mxu1 %v3116_v32 }
 0x51c   :  { %2497 = vmatprep.subr.bf16.mxu0 %v3126_v37  ;;  %2529 = vmatprep.subr.bf16.mxu1 %v3136_v41 }
 0x51f   :  { %2499 = vmatpush1.bf16.msra.mxu0 %v3149_v46  ;;  %2531 = vmatpush1.bf16.msra.mxu1 %v3159_v51 }
 0x520   :  { %2501 = vmatprep.subr.bf16.mxu0 %v3169_v55  ;;  %2533 = vmatprep.subr.bf16.mxu1 %v3179_v59 }
 0x523   :  { %2503 = vmatpush1.bf16.msra.mxu0 %v3192_v0  ;;  %2535 = vmatpush1.bf16.msra.mxu1 %v3202_v6 }
 0x524   :  { %2505 = vmatprep.subr.bf16.mxu0 %v3212_v10  ;;  %2537 = vmatprep.subr.bf16.mxu1 %v3222_v14 }
 0x527   :  { %2507 = vmatpush1.bf16.msra.mxu0 %v3229_v17  ;;  %2539 = vmatpush1.bf16.msra.mxu1 %v3233_v19 }
 0x528   :  { %2541 = vmatprep.subr.bf16.mxu0 %v2905_v29  ;;  %2573 = vmatprep.subr.bf16.mxu1 %v2921_v34 }
 0x5dd   :  { %v1345_v12 = vpop.f32.mrb[10].mxu0  ;;  %v1416_v13 = vpop.f32.mrb[10].mxu1 }
 0x5de   :  { %v2650_v16 = vadd.f32 %v1345_v12, %v3285_v27  ;;  %v1347_v20 = vpop.f32.mrb[11].mxu0  ;;  %v1418_v33 = vpop.f32.mrb[11].mxu1  ;;  %v2666_v45 = vadd.f32 %v1416_v13, %v3294_v56  ;;  %v1784_v12 = vld [vmem:[%s3642_s4 + $0x20] sm:$0xff]  ;;  %v1785_v13 = vld [vmem:[%s3642_s4 + $0x28] sm:$0xff] }
 0x5df   :  { %v2651_v36 = vadd.f32 %v1347_v20, %v3287_v31  ;;  %v2667_v44 = vadd.f32 %v1418_v33, %v3290_v43  ;;  %v1786_v20 = vld [vmem:[%s3642_s4 + $0x30] sm:$0xff]  ;;  %v1787_v33 = vld [vmem:[%s3642_s4 + $0x38] sm:$0xff] }
 0x5e0   :  { %v1425_v39 = vmul.f32 0.5, %v2650_v16  ;;  %v1427_v29 = vmul.f32 0.5, %v2666_v45  ;;  %v2611_v16 = vpack.c.bf16 %v1785_v13, %v1784_v12  ;;  %v1790_v45 = vld [vmem:[%s3642_s4 + $0x50] sm:$0xff] }
 0x5e1   :  { %v1426_v40 = vmul.f32 0.5, %v2651_v36  ;;  %v2614_v36 = vpack.c.bf16 %v1787_v33, %v1786_v20 }
 0x5e2   :  { %2758 = vtanh.f32 %v1425_v39  ;;  %v1788_v39 = vld [vmem:[%s3642_s4 + $0x40] sm:$0xff] }
 0x5e3   :  { %2760 = vtanh.f32 %v1426_v40  ;;  %v1789_v40 = vld [vmem:[%s3642_s4 + $0x48] sm:$0xff] }
 0x5e4   :  { %2762 = vtanh.f32 %v2667_v44  ;;  %v2617_v44 = vpack.c.bf16 %v1789_v40, %v1788_v39 }
 0x5e5   :  { %2764 = vtanh.f32 %v1427_v29  ;;  %v1791_v29 = vld [vmem:[%s3642_s4 + $0x58] sm:$0xff] }
 0x5ec   :  { %v2759_v48 = vpop.eup %2758 }
 0x5ed   :  { %v1431_v34 = vadd.f32 1.0, %v2759_v48  ;;  %v2761_v49 = vpop.eup %2760  ;;  %v2620_v48 = vpack.c.bf16 %v1791_v29, %v1790_v45 }
 0x5ee   :  { %v1432_v53 = vadd.f32 1.0, %v2761_v49  ;;  %v2763_v57 = vpop.eup %2762  ;;  %v1793_v49 = vld [vmem:[%s3642_s4 + $0x68] sm:$0xff] }
 0x5ef   :  { %v1434_v52 = vmul.f32 0.5, %v1431_v34  ;;  %v2765_v4 = vpop.eup %2764  ;;  %v1792_v34 = vld [vmem:[%s3642_s4 + $0x60] sm:$0xff] }
 0x5f0   :  { %v1435_v60 = vmul.f32 0.5, %v1432_v53  ;;  %v1433_v7 = vadd.f32 1.0, %v2765_v4  ;;  %v1794_v53 = vld [vmem:[%s3642_s4 + $0x70] sm:$0xff]  ;;  %v1877_v4 = vld [vmem:[%s3643_s6 + $0x18] sm:$0xff] }
 0x5f1   :  { %v1439_v62 = vmul.f32 %v2763_v57, %v1434_v52  ;;  %v2623_v52 = vpack.c.bf16 %v1793_v49, %v1792_v34  ;;  %v1795_v57 = vld [vmem:[%s3642_s4 + $0x78] sm:$0xff] }
 0x5f2   :  { %v1438_v63 = vmul.f32 %v1435_v60, %v3465_v9  ;;  %v1436_v22 = vmul.f32 0.5, %v1433_v7  ;;  %v1782_v9 = vld [vmem:[%s3642_s4 + $0x10] sm:$0xff]  ;;  %v2626_v60 = vpack.c.bf16 %v1795_v57, %v1794_v53 }
 0x5f3   :  { %v2608_v30 = vpack.c.bf16 %v1783_v26, %v1782_v9  ;;  %v1990_v26 = vld [vmem:[%s3645_s7] ss:$0 sm:$0xff] }
 0x5f4   :  { %v3507_v2 = vadd.f32 %v1439_v62, %v1438_v63  ;;  %v1874_v62 = vld [vmem:[%s3643_s6] sm:$0xff]  ;;  %v1876_v63 = vld [vmem:[%s3643_s6 + $0x10] sm:$0xff] }
 0x5f5   :  { %v2632_v7 = vpack.c.bf16 %v1877_v4, %v1876_v63 }
 0x5f6   :  { %2766 = vtanh.f32 %v3507_v2 }
 0x600   :  { %v2767_v23 = vpop.eup %2766 }
 0x601   :  { %v1442_v25 = vmul.f32 %v2767_v23, %v1436_v22  ;;  %v1878_v22 = vld [vmem:[%s3643_s6 + $0x20] sm:$0xff]  ;;  %v1879_v23 = vld [vmem:[%s3643_s6 + $0x28] sm:$0xff] }
 0x603   :  { %1512 = vmatmul.mubr.f32.vlgmr.msra.gmra.mrb[12].mxu0 %v1442_v25  ;;  %1583 = vmatmul.mubr.f32.vlgmr.msra.gmra.mrb[12].mxu1 %v1442_v25  ;;  %v2635_v25 = vpack.c.bf16 %v1879_v23, %v1878_v22 }
 0x604   :  { %2543 = vmatpush1.bf16.msra.mxu0 %v2923_v35  ;;  %2575 = vmatpush1.bf16.msra.mxu1 %v2934_v38 }
 0x605   :  { %2545 = vmatprep.subr.bf16.mxu0 %v2946_v42  ;;  %2577 = vmatprep.subr.bf16.mxu1 %v2961_v47 }
 0x606   :  { %1679 = vmatprep.mubr.f32.mxu0 %v2788_v3  ;;  %1750 = vmatprep.mubr.f32.mxu1 %v2788_v3 }
 0x608   :  { %2547 = vmatpush1.bf16.msra.mxu0 %v2971_v50  ;;  %2579 = vmatpush1.bf16.msra.mxu1 %v2984_v54 }
 0x609   :  { %2549 = vmatprep.subr.bf16.mxu0 %v2997_v58  ;;  %2581 = vmatprep.subr.bf16.mxu1 %v3007_v61 }
 0x60c   :  { %2551 = vmatpush1.bf16.msra.mxu0 %v3020_v1  ;;  %2583 = vmatpush1.bf16.msra.mxu1 %v3030_v5 }
 0x60d   :  { %2553 = vmatprep.subr.bf16.mxu0 %v3040_v8  ;;  %2585 = vmatprep.subr.bf16.mxu1 %v3050_v11 }
 0x610   :  { %2555 = vmatpush1.bf16.msra.mxu0 %v3063_v15  ;;  %2587 = vmatpush1.bf16.msra.mxu1 %v3073_v18 }
 0x611   :  { %2557 = vmatprep.subr.bf16.mxu0 %v3083_v21  ;;  %2589 = vmatprep.subr.bf16.mxu1 %v3093_v24 }
 0x614   :  { %2559 = vmatpush1.bf16.msra.mxu0 %v3106_v28  ;;  %2591 = vmatpush1.bf16.msra.mxu1 %v3116_v32 }
 0x615   :  { %2561 = vmatprep.subr.bf16.mxu0 %v3126_v37  ;;  %2593 = vmatprep.subr.bf16.mxu1 %v3136_v41 }
 0x618   :  { %2563 = vmatpush1.bf16.msra.mxu0 %v3149_v46  ;;  %2595 = vmatpush1.bf16.msra.mxu1 %v3159_v51 }
 0x619   :  { %2565 = vmatprep.subr.bf16.mxu0 %v3169_v55  ;;  %2597 = vmatprep.subr.bf16.mxu1 %v3179_v59 }
 0x61c   :  { %2567 = vmatpush1.bf16.msra.mxu0 %v3192_v0  ;;  %2599 = vmatpush1.bf16.msra.mxu1 %v3202_v6 }
 0x61d   :  { %2569 = vmatprep.subr.bf16.mxu0 %v3212_v10  ;;  %2601 = vmatprep.subr.bf16.mxu1 %v3222_v14  ;;  %v1780_v10 = vld [vmem:[%s3642_s4] sm:$0xff]  ;;  %v1781_v14 = vld [vmem:[%s3642_s4 + $0x8] sm:$0xff] }
 0x620   :  { %2571 = vmatpush1.bf16.msra.mxu0 %v3229_v17  ;;  %2603 = vmatpush1.bf16.msra.mxu1 %v3233_v19  ;;  %v2605_v17 = vpack.c.bf16 %v1781_v14, %v1780_v10  ;;  %v2790_v19 = vmov 0.0|0.0  }
 0x621   :  { %2604 = vmatprep.subr.bf16.mxu0 %v2790_v19  ;;  %2628 = vmatprep.subr.bf16.mxu1 %v2790_v19 }
 0x6d6   :  { %v1513_v35 = vpop.f32.mrb[12].mxu0  ;;  %v1584_v38 = vpop.f32.mrb[12].mxu1 }
 0x6d7   :  { %v2652_v42 = vadd.f32 %v1513_v35, %v3285_v27  ;;  %v1515_v47 = vpop.f32.mrb[13].mxu0  ;;  %v1586_v50 = vpop.f32.mrb[13].mxu1  ;;  %v2668_v5 = vadd.f32 %v1584_v38, %v3294_v56 }
 0x6d8   :  { %v2653_v54 = vadd.f32 %v1515_v47, %v3287_v31  ;;  %v2669_v1 = vadd.f32 %v1586_v50, %v3290_v43 }
 0x6d9   :  { %v1593_v58 = vmul.f32 0.5, %v2652_v42  ;;  %v1595_v8 = vmul.f32 0.5, %v2668_v5 }
 0x6da   :  { %v1594_v61 = vmul.f32 0.5, %v2653_v54 }
 0x6db   :  { %2768 = vtanh.f32 %v1593_v58 }
 0x6dc   :  { %2770 = vtanh.f32 %v1594_v61 }
 0x6dd   :  { %2772 = vtanh.f32 %v2669_v1 }
 0x6de   :  { %2774 = vtanh.f32 %v1595_v8 }
 0x6e5   :  { %v2769_v11 = vpop.eup %2768 }
 0x6e6   :  { %v1599_v15 = vadd.f32 1.0, %v2769_v11  ;;  %v2771_v18 = vpop.eup %2770 }
 0x6e7   :  { %v1600_v24 = vadd.f32 1.0, %v2771_v18  ;;  %v2773_v28 = vpop.eup %2772 }
 0x6e8   :  { %v1602_v21 = vmul.f32 0.5, %v1599_v15  ;;  %v2775_v51 = vpop.eup %2774 }
 0x6e9   :  { %v1603_v32 = vmul.f32 0.5, %v1600_v24  ;;  %v1601_v55 = vadd.f32 1.0, %v2775_v51 }
 0x6ea   :  { %v1607_v37 = vmul.f32 %v2773_v28, %v1602_v21 }
 0x6eb   :  { %v1606_v41 = vmul.f32 %v1603_v32, %v3507_v2  ;;  %v1604_v59 = vmul.f32 0.5, %v1601_v55 }
 0x6ed   :  { %v3547_v46 = vadd.f32 %v1607_v37, %v1606_v41 }
 0x6ef   :  { %2776 = vtanh.f32 %v3547_v46 }
 0x6f9   :  { %v2777_v0 = vpop.eup %2776 }
 0x6fa   :  { %v1610_v6 = vmul.f32 %v2777_v0, %v1604_v59  ;;  %v1880_v0 = vld [vmem:[%s3643_s6 + $0x30] sm:$0xff] }
 0x6fc   :  { %1680 = vmatmul.mubr.f32.vlgmr.msra.gmra.mrb[14].mxu0 %v1610_v6  ;;  %1751 = vmatmul.mubr.f32.vlgmr.msra.gmra.mrb[14].mxu1 %v1610_v6  ;;  %v1881_v6 = vld [vmem:[%s3643_s6 + $0x38] sm:$0xff] }
 0x6fd   :  { %2606 = vmatpush3.bf16.msra.mxu0 %v2605_v17  ;;  %2050 = vmatprep.mubr.msk.f32.mxu0 %vm2791_vm4, %v2788_v3  ;;  %v2638_v10 = vpack.c.bf16 %v1881_v6, %v1880_v0 }
 0x6fe   :  { %2607 = vmatprep.subr.bf16.mxu0 %v2790_v19  ;;  %2069 = vmatprep.mubr.msk.f32.mxu1 %vm2791_vm4, %v2788_v3  ;;  %v1875_v3 = vld [vmem:[%s3643_s6 + $0x8] sm:$0xff] }
 0x6ff   :  { %v2629_v2 = vpack.c.bf16 %v1875_v3, %v1874_v62 }
 0x701   :  { %2609 = vmatpush3.bf16.msra.mxu0 %v2608_v30  ;;  %2630 = vmatpush3.bf16.msra.mxu1 %v2629_v2 }
 0x702   :  { %2610 = vmatprep.subr.bf16.mxu0 %v2790_v19  ;;  %2631 = vmatprep.subr.bf16.mxu1 %v2790_v19 }
 0x705   :  { %2612 = vmatpush3.bf16.msra.mxu0 %v2611_v16  ;;  %2633 = vmatpush3.bf16.msra.mxu1 %v2632_v7 }
 0x706   :  { %2613 = vmatprep.subr.bf16.mxu0 %v2790_v19  ;;  %2634 = vmatprep.subr.bf16.mxu1 %v2790_v19 }
 0x709   :  { %2615 = vmatpush3.bf16.msra.mxu0 %v2614_v36  ;;  %2636 = vmatpush3.bf16.msra.mxu1 %v2635_v25 }
 0x70a   :  { %2616 = vmatprep.subr.bf16.mxu0 %v2790_v19  ;;  %2637 = vmatprep.subr.bf16.mxu1 %v2790_v19 }
 0x70d   :  { %2618 = vmatpush3.bf16.msra.mxu0 %v2617_v44  ;;  %2639 = vmatpush3.bf16.msra.mxu1 %v2638_v10 }
 0x70e   :  { %2619 = vmatprep.subr.bf16.mxu0 %v2790_v19 }
 0x711   :  { %2621 = vmatpush3.bf16.msra.mxu0 %v2620_v48 }
 0x712   :  { %2622 = vmatprep.subr.bf16.mxu0 %v2790_v19 }
 0x715   :  { %2624 = vmatpush3.bf16.msra.mxu0 %v2623_v52 }
 0x716   :  { %2625 = vmatprep.subr.bf16.mxu0 %v2790_v19 }
 0x719   :  { %2627 = vmatpush3.bf16.msra.mxu0 %v2626_v60 }
 0x7cf   :  { %v1681_v35 = vpop.f32.mrb[14].mxu0  ;;  %v1752_v38 = vpop.f32.mrb[14].mxu1 }
 0x7d0   :  { %v2654_v42 = vadd.f32 %v1681_v35, %v3285_v27  ;;  %v1683_v47 = vpop.f32.mrb[15].mxu0  ;;  %v1754_v50 = vpop.f32.mrb[15].mxu1  ;;  %v2670_v5 = vadd.f32 %v1752_v38, %v3294_v56 }
 0x7d1   :  { %v2655_v54 = vadd.f32 %v1683_v47, %v3287_v31  ;;  %v2671_v1 = vadd.f32 %v1754_v50, %v3290_v43 }
 0x7d2   :  { %v1761_v58 = vmul.f32 0.5, %v2654_v42  ;;  %v1763_v8 = vmul.f32 0.5, %v2670_v5 }
 0x7d3   :  { %v1762_v61 = vmul.f32 0.5, %v2655_v54 }
 0x7d4   :  { %2778 = vtanh.f32 %v1761_v58 }
 0x7d5   :  { %2780 = vtanh.f32 %v1762_v61 }
 0x7d6   :  { %2782 = vtanh.f32 %v2671_v1 }
 0x7d7   :  { %2784 = vtanh.f32 %v1763_v8 }
 0x7de   :  { %v2779_v11 = vpop.eup %2778 }
 0x7df   :  { %v1767_v15 = vadd.f32 1.0, %v2779_v11  ;;  %v2781_v18 = vpop.eup %2780 }
 0x7e0   :  { %v1768_v27 = vadd.f32 1.0, %v2781_v18  ;;  %v2783_v24 = vpop.eup %2782 }
 0x7e1   :  { %v1770_v21 = vmul.f32 0.5, %v1767_v15  ;;  %v2785_v41 = vpop.eup %2784 }
 0x7e2   :  { %v1771_v28 = vmul.f32 0.5, %v1768_v27  ;;  %v1769_v43 = vadd.f32 1.0, %v2785_v41 }
 0x7e3   :  { %v1775_v32 = vmul.f32 %v2783_v24, %v1770_v21 }
 0x7e4   :  { %v1774_v31 = vmul.f32 %v1771_v28, %v3547_v46  ;;  %v1772_v51 = vmul.f32 0.5, %v1769_v43  ;;  %v1989_v46 = vld [vmem:[%s3644_s5] ss:$0 sm:$0xff] }
 0x7e6   :  { %v1776_v37 = vadd.f32 %v1775_v32, %v1774_v31 }
 0x7e8   :  { %2786 = vtanh.f32 %v1776_v37 }
 0x7f2   :  { %v2787_v55 = vpop.eup %2786 }
 0x7f3   :  { %v1778_v59 = vmul.f32 %v2787_v55, %v1772_v51 }
 0x7f5   :  { %v1779_v56 = vmax.f32 %v1778_v59, 0.0 }
 0x7f7   :  { %2051 = vmatmul.mubr.f32.vlgmr.msra.gmra.mrb[16].mxu0 %v1779_v56 }
 0x8ca   :  { %v1869_v14 = vpop.f32.mrb[16].mxu0 }
 0x8cb   :  { %v1870_v17 = vadd.f32 %v1989_v46, %v1869_v14  ;;  %v2052_v19 = vpop.f32.mrb[17].mxu0 }
 0x8cd   :  { %v1873_v9 = vmax.f32 %v1870_v17, 0.0 }
 0x8cf   :  { %2070 = vmatmul.mubr.msk.f32.vlgmr.msra.gmra.mrb[16].mxu1 %vm1889_vm5, %v1873_v9 }
 0x9a2   :  { %v1959_v30 = vpop.f32.mrb[16].mxu1 }
 0x9a3   :  { %v1960_v12 = vadd.f32 %v1990_v26, %v1959_v30  ;;  %v2071_v13 = vpop.f32.mrb[17].mxu1 }
 0x9a5   :  { %1964 = vst.msk [vmem:[%s3646_s8] sm:$0xff] %vm1963_vm6, %v1960_v12 }

</bundles_post_ra>
